<compile_context>
chip_gen: v5e
topology: v5e:2x2
jax: 0.10.0
libtpu: 0.0.40
codegen_flags: <defaults>
</compile_context>

<pallas_src>
import functools

import jax
import jax.numpy as jnp
from jax import lax
from jax.experimental import pallas as pl
from jax.experimental.pallas import tpu as pltpu


# ---------------------------------------------------------------------------
# Fused kernel: conv-matmul + bias + ReLU + GAP accumulate + head MLP epilogue
# ---------------------------------------------------------------------------
def _fused_trunk_head_kernel(p_ref, wc_ref, bc_ref, w1_ref, b1_ref,
                             w2_ref, b2_ref, o_ref, gap_ref, *, hw, tm):
    m = pl.program_id(1)
    nm = pl.num_programs(1)

    @pl.when(m == 0)
    def _():
        gap_ref[...] = jnp.zeros_like(gap_ref)

    # conv3x3 as one MXU matmul on the im2col patch tile (bf16 in, f32 accum).
    z = jnp.dot(p_ref[...], wc_ref[...], preferred_element_type=jnp.float32)
    z = jnp.maximum(z + bc_ref[...], 0.0)                       # (tm, Cout) f32

    # Mask rows that are zero-padding of the last pixel tile (cdiv padding).
    if hw % tm:
        row = m * tm + lax.broadcasted_iota(jnp.int32, (tm, 1), 0)
        z = jnp.where(row < hw, z, 0.0)

    # Global-average-pool: accumulate per-tile column sums (lane-dense (1,Cout)).
    gap_ref[...] += jnp.sum(z, axis=0, keepdims=True)

    @pl.when(m == nm - 1)
    def _():
        pooled = gap_ref[...] * (1.0 / hw)                      # (1, Cout) trunk features
        # head: Linear(512,512) with BatchNorm1d (eval) folded in, Dropout=id,
        #       ReLU, Linear(512, emb), ReLU — all on the resident weights.
        h1 = jnp.dot(pooled.astype(jnp.bfloat16), w1_ref[...],
                     preferred_element_type=jnp.float32) + b1_ref[...]
        h1 = jnp.maximum(h1, 0.0)
        h2 = jnp.dot(h1.astype(jnp.bfloat16), w2_ref[...],
                     preferred_element_type=jnp.float32) + b2_ref[...]
        o_ref[...] = jnp.maximum(h2, 0.0)                       # (1, emb), lane-dense


# ---------------------------------------------------------------------------
# Wrapper-side helpers
# ---------------------------------------------------------------------------
def _im2col_3x3(x):
    """3x3 / stride-1 / pad-1 im2col.  x: (B, C, H, W) -> (B, H*W, C*9)."""
    B, C, H, W = x.shape
    xp = jnp.pad(x, ((0, 0), (0, 0), (1, 1), (1, 1)))
    cols = [xp[:, :, dh:dh + H, dw:dw + W] for dh in range(3) for dw in range(3)]
    p = jnp.stack(cols, axis=-1)                # (B, C, H, W, 9)
    p = p.transpose(0, 2, 3, 1, 4)              # (B, H, W, C, 9)
    return p.reshape(B, H * W, C * 9)


def _fold_bn_into_linear(w, b, gamma, beta, mean, var, eps=1e-5):
    """Fold eval-mode BatchNorm1d into the preceding Linear (y = x @ w + b)."""
    scale = gamma / jnp.sqrt(var + eps)                               # (out,)
    return w * scale[None, :], (b - mean[None, :]) * scale[None, :] + beta[None, :]


def feature_extractor_bn_forward(images, params, *, tm=512):
    """Forward pass of FeatureExtractorBN as a single fused Pallas kernel."""
    B, C, H, W = images.shape
    HW = H * W
    K = C * 9
    Cout = params["w_conv"].shape[1]            # 512 (resnet18 feature width)
    emb = params["w2"].shape[1]

    # --- trunk input prep (XLA side): bf16 im2col patches ------------------
    # TODO(synk): the real trunk is torchvision resnet18 minus fc (7x7/s2 conv
    # + BN + maxpool + 8 BasicBlocks); it is stood in for by a single 3x3 conv
    # + ReLU + global-average-pool producing the same (B, 512) features.
    patches = _im2col_3x3(images.astype(jnp.bfloat16))                # (B, HW, K)

    tm = min(tm, ((HW + 7) // 8) * 8)           # keep second-minor 8-aligned
    n_m = pl.cdiv(HW, tm)
    HWp = n_m * tm
    if HWp != HW:                               # cdiv padding, masked in-kernel
        patches = jnp.pad(patches, ((0, 0), (0, HWp - HW), (0, 0)))

    # --- head weight prep: fold eval-mode BN into Linear1; bf16 MXU inputs --
    # TODO(synk): BatchNorm1d is eval-mode only (running stats); training-mode
    # batch statistics and Dropout sampling are not implemented.
    w1f, b1f = _fold_bn_into_linear(params["w1"], params["b1"],
                                    params["bn_gamma"], params["bn_beta"],
                                    params["bn_mean"], params["bn_var"])

    w_conv = params["w_conv"].astype(jnp.bfloat16)
    b_conv = params["b_conv"].astype(jnp.float32)
    w1 = w1f.astype(jnp.bfloat16)
    b1 = b1f.astype(jnp.float32)
    w2 = params["w2"].astype(jnp.bfloat16)
    b2 = params["b2"].astype(jnp.float32)

    kernel = functools.partial(_fused_trunk_head_kernel, hw=HW, tm=tm)

    out = pl.pallas_call(
        kernel,
        out_shape=jax.ShapeDtypeStruct((B, 1, emb), jnp.float32),
        grid=(B, n_m),
        in_specs=[
            pl.BlockSpec((None, tm, K), lambda b, m: (b, m, 0)),      # patches
            pl.BlockSpec((K, Cout), lambda b, m: (0, 0)),             # conv weight
            pl.BlockSpec((1, Cout), lambda b, m: (0, 0)),             # conv bias
            pl.BlockSpec((Cout, Cout), lambda b, m: (0, 0)),          # head W1 (BN folded)
            pl.BlockSpec((1, Cout), lambda b, m: (0, 0)),             # head b1 (BN folded)
            pl.BlockSpec((Cout, emb), lambda b, m: (0, 0)),           # head W2
            pl.BlockSpec((1, emb), lambda b, m: (0, 0)),              # head b2
        ],
        out_specs=pl.BlockSpec((None, 1, emb), lambda b, m: (b, 0, 0)),
        scratch_shapes=[pltpu.VMEM((1, Cout), jnp.float32)],          # GAP accumulator
        compiler_params=pltpu.CompilerParams(
            dimension_semantics=("parallel", "arbitrary")),
    )(patches, w_conv, b_conv, w1, b1, w2, b2)
    return out.reshape(B, emb)


# ---------------------------------------------------------------------------
# Pure-JAX reference (mirrors the kernel's bf16 input precision)
# ---------------------------------------------------------------------------
def _reference_forward(images, params):
    f32 = jnp.float32
    patches = _im2col_3x3(images.astype(jnp.bfloat16)).astype(f32)
    wc = params["w_conv"].astype(jnp.bfloat16).astype(f32)
    z = jnp.maximum(jnp.einsum("bpk,kn->bpn", patches, wc) + params["b_conv"], 0.0)
    pooled = jnp.mean(z, axis=1)                                      # (B, 512)
    w1f, b1f = _fold_bn_into_linear(params["w1"], params["b1"],
                                    params["bn_gamma"], params["bn_beta"],
                                    params["bn_mean"], params["bn_var"])
    w1 = w1f.astype(jnp.bfloat16).astype(f32)
    h1 = jnp.maximum(pooled.astype(jnp.bfloat16).astype(f32) @ w1 + b1f, 0.0)
    w2 = params["w2"].astype(jnp.bfloat16).astype(f32)
    h2 = jnp.maximum(h1.astype(jnp.bfloat16).astype(f32) @ w2 + params["b2"], 0.0)
    return h2


if __name__ == "__main__":
    B, C, H, W = 2, 3, 16, 16
    trunk_feat = 512          # resnet18 output feature width (fixed by the arch)
    emb_size = 128            # embedding size chosen lane-dense (multiple of 128)

    key = jax.random.PRNGKey(0)
    ks = jax.random.split(key, 11)
    images = jax.random.normal(ks[0], (B, C, H, W), jnp.float32)

    params = {
        # conv weight stored im2col-style: (Cin*9, Cout), used as x_patches @ w + b
        "w_conv": jax.random.normal(ks[1], (C * 9, trunk_feat), jnp.float32) * 0.1,
        "b_conv": jax.random.normal(ks[2], (1, trunk_feat), jnp.float32) * 0.01,
        # head Linear weights stored as (in_features, out_features): x @ W + b
        "w1": jax.random.normal(ks[3], (trunk_feat, trunk_feat), jnp.float32) * 0.05,
        "b1": jax.random.normal(ks[4], (1, trunk_feat), jnp.float32) * 0.01,
        # BatchNorm1d(512) affine + running stats (eval mode)
        "bn_gamma": jnp.abs(jax.random.normal(ks[5], (trunk_feat,), jnp.float32)) + 0.5,
        "bn_beta": jax.random.normal(ks[6], (trunk_feat,), jnp.float32) * 0.1,
        "bn_mean": jax.random.normal(ks[7], (trunk_feat,), jnp.float32) * 0.1,
        "bn_var": jnp.abs(jax.random.normal(ks[8], (trunk_feat,), jnp.float32)) + 1.0,
        "w2": jax.random.normal(ks[9], (trunk_feat, emb_size), jnp.float32) * 0.05,
        "b2": jax.random.normal(ks[10], (1, emb_size), jnp.float32) * 0.01,
    }

    embedding = jax.block_until_ready(feature_extractor_bn_forward(images, params))
    assert embedding.shape == (B, emb_size)
    assert bool(jnp.all(jnp.isfinite(embedding)))
    assert bool(jnp.all(embedding >= 0.0))        # final ReLU

    ref = _reference_forward(images, params)
    assert bool(jnp.allclose(embedding, ref, rtol=5e-2, atol=5e-2)), (
        "max abs err %.5f" % float(jnp.max(jnp.abs(embedding - ref))))

    print("KERNEL_OK")
</pallas_src>

<mosaic_0001>
module attributes {stable_mosaic.version = 11 : i64} {
  func.func @_fused_trunk_head_kernel(%arg0: i32, %arg1: i32, %arg2: memref<1x256x27xbf16, #tpu.memory_space<vmem>>, %arg3: memref<27x512xbf16, #tpu.memory_space<vmem>>, %arg4: memref<1x512xf32, #tpu.memory_space<vmem>>, %arg5: memref<512x512xbf16, #tpu.memory_space<vmem>>, %arg6: memref<1x512xf32, #tpu.memory_space<vmem>>, %arg7: memref<512x128xbf16, #tpu.memory_space<vmem>>, %arg8: memref<1x128xf32, #tpu.memory_space<vmem>>, %arg9: memref<1x1x128xf32, #tpu.memory_space<vmem>>, %arg10: memref<1x512xf32, #tpu.memory_space<vmem>>) attributes {dimension_semantics = [#tpu.dimension_semantics<parallel>, #tpu.dimension_semantics<arbitrary>], iteration_bounds = array<i64: 2, 1>, scalar_prefetch = 0 : i64, scratch_operands = 1 : i64, tpu.core_type = #tpu.core_type<tc>, window_params = [{transform_indices = @transform_0, window_bounds = array<i64: 1, 256, 27>}, {pipeline_mode = #tpu.pipeline_mode<synchronous>, transform_indices = @transform_1, window_bounds = array<i64: 27, 512>}, {pipeline_mode = #tpu.pipeline_mode<synchronous>, transform_indices = @transform_2, window_bounds = array<i64: 1, 512>}, {pipeline_mode = #tpu.pipeline_mode<synchronous>, transform_indices = @transform_3, window_bounds = array<i64: 512, 512>}, {pipeline_mode = #tpu.pipeline_mode<synchronous>, transform_indices = @transform_4, window_bounds = array<i64: 1, 512>}, {pipeline_mode = #tpu.pipeline_mode<synchronous>, transform_indices = @transform_5, window_bounds = array<i64: 512, 128>}, {pipeline_mode = #tpu.pipeline_mode<synchronous>, transform_indices = @transform_6, window_bounds = array<i64: 1, 128>}, {transform_indices = @transform_7, window_bounds = array<i64: 1, 1, 128>}]} {
    %c0_i32 = arith.constant 0 : i32
    %0 = arith.cmpi eq, %arg1, %c0_i32 : i32
    %1 = arith.extui %0 : i1 to i32
    %c0_i32_0 = arith.constant 0 : i32
    %2 = arith.cmpi ne, %1, %c0_i32_0 : i32
    scf.if %2 {
      %cst_15 = arith.constant 0.000000e+00 : f32
      %20 = vector.broadcast %cst_15 : f32 to vector<1x512xf32>
      %c0_16 = arith.constant 0 : index
      %c0_17 = arith.constant 0 : index
      %21 = vector.load %arg10[%c0_16, %c0_17] : memref<1x512xf32, #tpu.memory_space<vmem>>, vector<1x512xf32>
      tpu.vector_store %arg10[%c0_16, %c0_17], %20 {strides = array<i32>} : memref<1x512xf32, #tpu.memory_space<vmem>>, vector<1x512xf32>,
    } else {
    }
    %c0 = arith.constant 0 : index
    %c0_1 = arith.constant 0 : index
    %c0_2 = arith.constant 0 : index
    %3 = vector.load %arg2[%c0, %c0_1, %c0_2] : memref<1x256x27xbf16, #tpu.memory_space<vmem>>, vector<1x256x27xbf16>
    %4 = vector.shape_cast %3 : vector<1x256x27xbf16> to vector<256x27xbf16>
    %c0_3 = arith.constant 0 : index
    %c0_4 = arith.constant 0 : index
    %5 = vector.load %arg3[%c0_3, %c0_4] : memref<27x512xbf16, #tpu.memory_space<vmem>>, vector<27x512xbf16>
    %cst = arith.constant dense<0.000000e+00> : vector<256x512xf32>
    %6 = tpu.matmul %4, %5, %cst {dimension_numbers = #tpu.dot_dimension_numbers<[1], [0], [0], [1], [0, 0, 1, 1], [], []>} : vector<256x27xbf16>, vector<27x512xbf16>, vector<256x512xf32> -> vector<256x512xf32>
    %c0_5 = arith.constant 0 : index
    %c0_6 = arith.constant 0 : index
    %7 = vector.load %arg4[%c0_5, %c0_6] : memref<1x512xf32, #tpu.memory_space<vmem>>, vector<1x512xf32>
    %8 = vector.broadcast %7 : vector<1x512xf32> to vector<256x512xf32>
    %9 = arith.addf %6, %8 : vector<256x512xf32>
    %cst_7 = arith.constant 0.000000e+00 : f32
    %10 = vector.broadcast %cst_7 : f32 to vector<256x512xf32>
    %11 = arith.maximumf %9, %10 : vector<256x512xf32>
    %c0_8 = arith.constant 0 : index
    %c0_9 = arith.constant 0 : index
    %12 = vector.load %arg10[%c0_8, %c0_9] : memref<1x512xf32, #tpu.memory_space<vmem>>, vector<1x512xf32>
    %cst_10 = arith.constant dense<0.000000e+00> : vector<512xf32>
    %13 = vector.multi_reduction <add>, %11, %cst_10 [0] : vector<256x512xf32> to vector<512xf32>
    %14 = vector.shape_cast %13 : vector<512xf32> to vector<1x512xf32>
    %15 = arith.addf %12, %14 : vector<1x512xf32>
    %c0_11 = arith.constant 0 : index
    %c0_12 = arith.constant 0 : index
    %16 = vector.load %arg10[%c0_11, %c0_12] : memref<1x512xf32, #tpu.memory_space<vmem>>, vector<1x512xf32>
    tpu.vector_store %arg10[%c0_11, %c0_12], %15 {strides = array<i32>} : memref<1x512xf32, #tpu.memory_space<vmem>>, vector<1x512xf32>,
    %c0_i32_13 = arith.constant 0 : i32
    %17 = arith.cmpi eq, %arg1, %c0_i32_13 : i32
    %18 = arith.extui %17 : i1 to i32
    %c0_i32_14 = arith.constant 0 : i32
    %19 = arith.cmpi ne, %18, %c0_i32_14 : i32
    scf.if %19 {
      %c0_15 = arith.constant 0 : index
      %c0_16 = arith.constant 0 : index
      %20 = vector.load %arg10[%c0_15, %c0_16] : memref<1x512xf32, #tpu.memory_space<vmem>>, vector<1x512xf32>
      %cst_17 = arith.constant 3.906250e-03 : f32
      %21 = vector.broadcast %cst_17 : f32 to vector<1x512xf32>
      %22 = arith.mulf %20, %21 : vector<1x512xf32>
      %23 = arith.truncf %22 : vector<1x512xf32> to vector<1x512xbf16>
      %c0_18 = arith.constant 0 : index
      %c0_19 = arith.constant 0 : index
      %24 = vector.load %arg5[%c0_18, %c0_19] : memref<512x512xbf16, #tpu.memory_space<vmem>>, vector<512x512xbf16>
      %cst_20 = arith.constant dense<0.000000e+00> : vector<1x512xf32>
      %25 = tpu.matmul %23, %24, %cst_20 {dimension_numbers = #tpu.dot_dimension_numbers<[1], [0], [0], [1], [0, 0, 1, 1], [], []>} : vector<1x512xbf16>, vector<512x512xbf16>, vector<1x512xf32> -> vector<1x512xf32>
      %c0_21 = arith.constant 0 : index
      %c0_22 = arith.constant 0 : index
      %26 = vector.load %arg6[%c0_21, %c0_22] : memref<1x512xf32, #tpu.memory_space<vmem>>, vector<1x512xf32>
      %27 = arith.addf %25, %26 : vector<1x512xf32>
      %cst_23 = arith.constant 0.000000e+00 : f32
      %28 = vector.broadcast %cst_23 : f32 to vector<1x512xf32>
      %29 = arith.maximumf %27, %28 : vector<1x512xf32>
      %30 = arith.truncf %29 : vector<1x512xf32> to vector<1x512xbf16>
      %c0_24 = arith.constant 0 : index
      %c0_25 = arith.constant 0 : index
      %31 = vector.load %arg7[%c0_24, %c0_25] : memref<512x128xbf16, #tpu.memory_space<vmem>>, vector<512x128xbf16>
      %cst_26 = arith.constant dense<0.000000e+00> : vector<1x128xf32>
      %32 = tpu.matmul %30, %31, %cst_26 {dimension_numbers = #tpu.dot_dimension_numbers<[1], [0], [0], [1], [0, 0, 1, 1], [], []>} : vector<1x512xbf16>, vector<512x128xbf16>, vector<1x128xf32> -> vector<1x128xf32>
      %c0_27 = arith.constant 0 : index
      %c0_28 = arith.constant 0 : index
      %33 = vector.load %arg8[%c0_27, %c0_28] : memref<1x128xf32, #tpu.memory_space<vmem>>, vector<1x128xf32>
      %34 = arith.addf %32, %33 : vector<1x128xf32>
      %cst_29 = arith.constant 0.000000e+00 : f32
      %35 = vector.broadcast %cst_29 : f32 to vector<1x128xf32>
      %36 = arith.maximumf %34, %35 : vector<1x128xf32>
      %c0_30 = arith.constant 0 : index
      %c0_31 = arith.constant 0 : index
      %c0_32 = arith.constant 0 : index
      %37 = vector.load %arg9[%c0_30, %c0_31, %c0_32] : memref<1x1x128xf32, #tpu.memory_space<vmem>>, vector<1x1x128xf32>
      %38 = vector.shape_cast %37 : vector<1x1x128xf32> to vector<1x128xf32>
      %39 = vector.shape_cast %36 : vector<1x128xf32> to vector<1x1x128xf32>
      tpu.vector_store %arg9[%c0_30, %c0_31, %c0_32], %39 {strides = array<i32>} : memref<1x1x128xf32, #tpu.memory_space<vmem>>, vector<1x1x128xf32>,
    } else {
    }
    return
  }
  func.func @transform_0(%arg0: i32, %arg1: i32) -> (i32, i32, i32) {
    %c0_i32 = arith.constant 0 : i32
    %c0_i32_0 = arith.constant 0 : i32
    return %arg0, %arg1, %c0_i32 : i32, i32, i32
  }
  func.func @transform_1(%arg0: i32, %arg1: i32) -> (i32, i32) {
    %c0_i32 = arith.constant 0 : i32
    %c0_i32_0 = arith.constant 0 : i32
    %c0_i32_1 = arith.constant 0 : i32
    return %c0_i32, %c0_i32_0 : i32, i32
  }
  func.func @transform_2(%arg0: i32, %arg1: i32) -> (i32, i32) {
    %c0_i32 = arith.constant 0 : i32
    %c0_i32_0 = arith.constant 0 : i32
    %c0_i32_1 = arith.constant 0 : i32
    return %c0_i32, %c0_i32_0 : i32, i32
  }
  func.func @transform_3(%arg0: i32, %arg1: i32) -> (i32, i32) {
    %c0_i32 = arith.constant 0 : i32
    %c0_i32_0 = arith.constant 0 : i32
    %c0_i32_1 = arith.constant 0 : i32
    return %c0_i32, %c0_i32_0 : i32, i32
  }
  func.func @transform_4(%arg0: i32, %arg1: i32) -> (i32, i32) {
    %c0_i32 = arith.constant 0 : i32
    %c0_i32_0 = arith.constant 0 : i32
    %c0_i32_1 = arith.constant 0 : i32
    return %c0_i32, %c0_i32_0 : i32, i32
  }
  func.func @transform_5(%arg0: i32, %arg1: i32) -> (i32, i32) {
    %c0_i32 = arith.constant 0 : i32
    %c0_i32_0 = arith.constant 0 : i32
    %c0_i32_1 = arith.constant 0 : i32
    return %c0_i32, %c0_i32_0 : i32, i32
  }
  func.func @transform_6(%arg0: i32, %arg1: i32) -> (i32, i32) {
    %c0_i32 = arith.constant 0 : i32
    %c0_i32_0 = arith.constant 0 : i32
    %c0_i32_1 = arith.constant 0 : i32
    return %c0_i32, %c0_i32_0 : i32, i32
  }
  func.func @transform_7(%arg0: i32, %arg1: i32) -> (i32, i32, i32) {
    %c0_i32 = arith.constant 0 : i32
    %c0_i32_0 = arith.constant 0 : i32
    %c0_i32_1 = arith.constant 0 : i32
    return %arg0, %c0_i32, %c0_i32_0 : i32, i32, i32
  }
}

</mosaic_0001>

<bundles_post_ra>
// kernel: tpu_custom_call.1
= control target key start
LH: loop header
LB: loop body
LE: loop exit
PB: predicated region body
PF: predicated region fallthrough
CT: control target
= control target key end

     0   :  { %12 = vsyncpa [#allocation4], 0  ;;  %s4520_s0 = inlined_call_operand.vmem [shape: bf16[2,256,27], index: 0, kind: input, shape index: {}]   ;;  %s4521_s1 = inlined_call_operand.hbm [shape: bf16[27,512], index: 1, kind: input, shape index: {}]   ;;  %s4522_s2 = inlined_call_operand.vmem [shape: f32[1,512], index: 2, kind: input, shape index: {}]   ;;  %s4523_s3 = inlined_call_operand.hbm [shape: bf16[512,512], index: 3, kind: input, shape index: {}]   ;;  %s4524_s4 = inlined_call_operand.vmem [shape: f32[1,512], index: 4, kind: input, shape index: {}]   ;;  %s4525_s5 = inlined_call_operand.vmem [shape: bf16[512,128], index: 5, kind: input, shape index: {}]   ;;  %s4526_s6 = inlined_call_operand.vmem [shape: f32[1,128], index: 6, kind: input, shape index: {}]   ;;  %s4527_s7 = inlined_call_operand.hbm [shape: f32[2,1,128], index: 7, kind: output, shape index: {}]  }
   0x1   :  { %13 = vsyncpa [#allocation7], 0 }
   0x2   :  { %14 = vsyncpa [#allocation5], 0 }
   0x3   :  { %16 = vsyncpa [#allocation5 + $0x1], 0  ;;  %s3931_s24 = smov 0   ;;  %s3933_s25 = smov 0  }
   0x4   :  { %s3935_s26 = smov 0   ;;  %s3937_s27 = smov 0  }
   0x5   :  { %s3939_s28 = smov 0   ;;  %s3941_s29 = smov 0  }
   0x6 LB: > { %s2659_s30 = sadd.s32 4294967295, %s3883_s29   ;;  %s2660_s8 = sadd.s32 4294967294, %s3883_s29   ;;  %s3883_s29 = sphi %s3941_s29, %s22_s29   ;;  %s3879_s28 = sphi %s3939_s28, %s4538_s28   ;;  %s3875_s27 = sphi %s3937_s27, %s4537_s27   ;;  %s3871_s26 = sphi %s3935_s26, %s4536_s26   ;;  %s3867_s25 = sphi %s3933_s25, %s4535_s25   ;;  %s3863_s24 = sphi %s3931_s24, %s4534_s24  }
   0x7   : > { %s34_s9 = sadd.s32 1, %s3879_s28  ;;  %s195_s10 = sadd.s32 1, %s3871_s26 }
   0x8   : > { %p36_p0 = scmp.ge.s32.totalorder %s34_s9, 2  ;;  %p205_p1 = scmp.ne.s32.totalorder %s3871_s26, %s3867_s25 }
   0x9   : > { %p206_p2 = scmp.eq.s32.totalorder %s2659_s30, 1  ;;  %p211_p3 = scmp.ne.s32.totalorder %s3867_s25, %s3863_s24 }
   0xa   : > { %s4540_s9 = smov (%p36_p0, %s34_s9), 0  ;;  %p212_p5 = scmp.eq.s32.totalorder %s2660_s8, 1 }
   0xb   : > { %p3971_p4 = por %p206_p2, %p205_p1  ;;  %s192_s12 = ssub.s32 %s3879_s28, %s4540_s9 }
   0xc   : > { %p2661_p6 = scmp.ge.s32.totalorder %s3883_s29, 1  ;;  %p193_p7 = scmp.eq.s32.totalorder %s192_s12, 0 }
   0xd   : > { %p3978_p8 = por %p212_p5, %p211_p3  ;;  %p219_p9 = scmp.lt.s32.totalorder %s3883_s29, 3 }
   0xe   : > { %s3984_s14 = scalar_select %p193_p7, %s3871_s26, %s195_s10  }
   0xf   : > { %p3986_p10 = pnand %p2661_p6, %p219_p9  ;;  %p3990_p11 = scmp.eq.s32.totalorder %s2659_s30, 0 }
  0x10   : > { %s230_s19 = sshll.u32 %s4521_s1, 4  ;;  %s3885_s20 = smov [#allocation3]   ;;  %s231_s19 = int_to_ptr.hbm [resolvable:$true] %s230_s19 }
  0x11   : > { %p3667_p12 = pneg %p3986_p10  ;;  %s232_s21 = sshll.u32 %s3885_s20, 4  ;;  %s233_s21 = int_to_ptr.vmem [resolvable:$true] %s232_s21 }
  0x12   : > { %s247_s30 = sshll.u32 %s4523_s3, 4  ;;  %s3886_s8 = smov 256   ;;  %s248_s30 = int_to_ptr.hbm [resolvable:$true] %s247_s30 }
  0x13   : > { %p3668_p13 = pnand %p3990_p11, %p3667_p12  ;;  %s3887_s10 = smov 16  }
  0x14   : > { %s3888_s12 = smov [#allocation6]   ;;  %287 = sbr.rel (%p3986_p10) target bundleno = 808 (0x328), region = 48 }
  0x15   : > { %3670 = dma.hbm_to_vmem [thread:$0]  (!%p3668_p13), %s231_s19, 1024, %s233_s21, [#allocation4], %s3886_s8, %s3886_s8, %s3887_s10  }
  0x16   : > { %s249_s17 = sshll.u32 %s3888_s12, 4  ;;  %s250_s17 = int_to_ptr.vmem [resolvable:$true] %s249_s17 }
  0x17   : > { %3673 = dma.hbm_to_vmem [thread:$0]  (!%p3668_p13), %s248_s30, 16384, %s250_s17, [#allocation7], %s3886_s8, %s3886_s8, %s3887_s10  }
  0x19   : > { %3850 = dma.done.wait (%p3990_p11), [#allocation4], 1024  }
  0x1a   : > { %3852 = vsyncadd (%p3990_p11), [#allocation4], 4294966272 }
  0x1b   : > { %3854 = dma.done.wait (%p3990_p11), [#allocation7], 16384  }
  0x1c   : > { %3856 = vsyncadd (%p3990_p11), [#allocation7], 4294950912  ;;  %vm563_vm0 = vcmask 1044480   ;;  %p329_p0 = scmp.lt.s32.totalorder %s3875_s27, 1  ;;  %vm564_vm1 = vcmask 1045504   ;;  %v3889_v0 = vmov 65535  }
  0x1d   : > { %v565_v1 = vsel %vm563_vm0, 4294967295, %v3889_v0  ;;  %v2752_v3 = vld [vmem:[#allocation3 + $0x20] sm:$0xf]  ;;  %v3495_v4 = vld [vmem:[#allocation3 + $0x2c] sm:$0x30]  ;;  %vm514_vm2 = vcmask 220160  }
  0x1e   : > { %s4016_s18 = scalar_select %p329_p0, %s3875_s27, 1  ;;  %v566_v2 = vsel %vm564_vm1, %v565_v1, 0  ;;  %v3493_v5 = vld [vmem:[#allocation3 + $0x24] sm:$0xf]  ;;  %v2753_v6 = vor.u32 %v3495_v4, %v2752_v3  ;;  %v2754_v7 = vld [vmem:[#allocation3 + $0x30] sm:$0x30] }
  0x1f   : > { %v2760_v8 = vld [vmem:[#allocation3 + $0x28] sm:$0xf]  ;;  %v3496_v9 = vld [vmem:[#allocation3 + $0x34] sm:$0x30]  ;;  %v2757_v10 = vor.u32 %v3493_v5, %v2754_v7  ;;  %v3494_v12 = vld [vmem:[#allocation3 + $0x2c] sm:$0xf] }
  0x20   : > { %s3472_s15 = sshll.u32 %s4016_s18, 7  ;;  %v2761_v11 = vor.u32 %v3496_v9, %v2760_v8  ;;  %v2762_v13 = vld [vmem:[#allocation3 + $0x38] sm:$0x30]  ;;  %v2736_v14 = vld [vmem:[#allocation3] sm:$0xf]  ;;  %v568_v15 = vand.u32 %v2753_v6, %v566_v2  ;;  %vm1219_vm4 = vcmask 1040384   ;;  %s2564_s18 = scalar_lea.hbm %s4527_s7, %s3875_s27 }
  0x21   : > { %v2765_v16 = vor.u32 %v3494_v12, %v2762_v13  ;;  %v3491_v17 = vld [vmem:[#allocation3 + $0xc] sm:$0xf0]  ;;  %v3489_v18 = vld [vmem:[#allocation3 + $0x4] sm:$0xf]  ;;  %v2738_v19 = vld [vmem:[#allocation3 + $0x10] sm:$0xf0]  ;;  %v571_v20 = vand.u32 %v2757_v10, %v566_v2  ;;  %s4022_s20 = scalar_lea.vmem %s4520_s0, %s3472_s15 }
  0x22   : > { %v574_v21 = vand.u32 %v2761_v11, %v566_v2  ;;  %v2744_v22 = vld [vmem:[#allocation3 + $0x8] sm:$0xf]  ;;  %v3492_v23 = vld [vmem:[#allocation3 + $0x14] sm:$0xf0]  ;;  %v3490_v24 = vld [vmem:[#allocation3 + $0xc] sm:$0xf]  ;;  %585 = vmatpush.bf16.msra.mxu0 %v568_v15  ;;  %v2737_v26 = vor.u32 %v3491_v17, %v2736_v14  ;;  %v2741_v28 = vor.u32 %v3489_v18, %v2738_v19 }
  0x23   : > { %v577_v25 = vand.u32 %v2765_v16, %v566_v2  ;;  %v2746_v27 = vld [vmem:[#allocation3 + $0x18] sm:$0xf0]  ;;  %674 = vmatpush.bf16.msra.mxu1 %v571_v20  ;;  %v2745_v29 = vor.u32 %v3492_v23, %v2744_v22  ;;  %v3474_v32 = vld [vmem:[%s4022_s20 + $0x8] sm:$0xff]  ;;  %v3475_v33 = vld [vmem:[%s4022_s20 + $0x10] sm:$0xff]  ;;  %vm1221_vm5 = vcmask 1042434   ;;  %vm1223_vm6 = vcmask 1041408  }
  0x24   : > { %763 = vmatpush.bf16.msra.mxu2 %v574_v21  ;;  %v2749_v30 = vor.u32 %v3490_v24, %v2746_v27  ;;  %v3473_v31 = vld [vmem:[%s4022_s20] sm:$0xff]  ;;  %v3476_v34 = vld [vmem:[%s4022_s20 + $0x18] sm:$0xff]  ;;  %v3478_v36 = vld [vmem:[%s4022_s20 + $0x28] sm:$0xff]  ;;  %s326_s10 = sand.u32 1, %s3867_s25   ;;  %s2568_s19 = sshll.u32 %s2564_s18, 4  ;;  %s2569_s19 = int_to_ptr.hbm [resolvable:$true] %s2568_s19 }
  0x25   : > { %852 = vmatpush.bf16.msra.mxu3 %v577_v25  ;;  %v3477_v35 = vld [vmem:[%s4022_s20 + $0x20] sm:$0xff]  ;;  %v3479_v37 = vld [vmem:[%s4022_s20 + $0x30] sm:$0xff]  ;;  %v3480_v38 = vld [vmem:[%s4022_s20 + $0x38] sm:$0xff]  ;;  %s327_s15 = scalar_lea.vmem [#allocation8], %s326_s10  ;;  %s3811_s21 = sshra.s32 %s2569_s19, 4  ;;  %s3812_s21 = int_to_ptr.hbm [resolvable:$true] %s3811_s21 }
  0x26   : > { %586 = vmatpush.bf16.msra.mxu0 %v2737_v26  ;;  %v3481_v39 = vld [vmem:[%s4022_s20 + $0x40] sm:$0xff]  ;;  %v3482_v0 = vld [vmem:[%s4022_s20 + $0x48] sm:$0xff]  ;;  %v3591_v19 = vld [vmem:[#allocation6 + $0x2ec] sm:$0xf0]  ;;  %s2566_s16 = sshll.u32 %s327_s15, 4  ;;  %s3813_s22 = scalar_lea.hbm %s3812_s21, 1  ;;  %s2567_s16 = int_to_ptr.vmem [resolvable:$true] %s2566_s16 }
  0x27   : > { %675 = vmatpush.bf16.msra.mxu1 %v2741_v28  ;;  %v388_v40 = vld [vmem:[%s4522_s2] sm:$0xf]  ;;  %v3200_v18 = vld [vmem:[#allocation6 + $0x2e0] sm:$0xf]  ;;  %v3527_v23 = vld [vmem:[#allocation6 + $0xec] sm:$0xf0]  ;;  %p3814_p1 = scmp.ne.s32.totalorder %s3812_s21, %s3813_s22  ;;  %p3818_p5 = scmp.lt.s32.totalorder %s3812_s21, %s4527_s7 }
  0x28   : > { %764 = vmatpush.bf16.msra.mxu2 %v2745_v29  ;;  %v4068_v42 = vperm.slane %v388_v40, 0  ;;  %v4071_v44 = vperm.slane %v388_v40, 1  ;;  %v4079_v53 = vperm.slane %v388_v40, 2  ;;  %v4082_v55 = vperm.slane %v388_v40, 3  ;;  %v2944_v20 = vld [vmem:[#allocation6 + $0xe0] sm:$0xf] }
  0x29   : > { %853 = vmatpush.bf16.msra.mxu3 %v2749_v30  ;;  %2766 = vmatmul.msk.bf16.vlgmr.msra.gmra.mxu0 %vm514_vm2, %v3473_v31  ;;  %v3201_v22 = vor.u32 %v3591_v19, %v3200_v18  ;;  %v3328_v24 = vld [vmem:[#allocation6 + $0x3e0] sm:$0xf]  ;;  %v3623_v25 = vld [vmem:[#allocation6 + $0x3ec] sm:$0xf0]  ;;  %v2945_v29 = vor.u32 %v3527_v23, %v2944_v20  ;;  %v3484_v20 = vld [vmem:[%s4022_s20 + $0x58] sm:$0xff]  ;;  %p3815_p2 = pnand %p3814_p1, %p3971_p4  ;;  %s3817_s30 = scalar_lea.hbm %s4527_s7, 2 }
  0x2a   : > { %2782 = vmatmul.msk.bf16.vlgmr.msra.gmra.mxu1 %vm514_vm2, %v3473_v31  ;;  %v3329_v30 = vor.u32 %v3623_v25, %v3328_v24  ;;  %p3819_p6 = scmp.lt.s32.totalorder %s3817_s30, %s3813_s22 }
  0x2b   : > { %2798 = vmatmul.msk.bf16.vlgmr.msra.gmra.mxu2 %vm514_vm2, %v3473_v31  ;;  %2028 = vmatpush.bf16.msrb.mxu0 %v2945_v29  ;;  %p3816_p3 = pneg %p3815_p2 }
  0x2c   : > { %2814 = vmatmul.msk.bf16.vlgmr.msra.gmra.mxu3 %vm514_vm2, %v3473_v31  ;;  %v3072_v31 = vld [vmem:[#allocation6 + $0x1e0] sm:$0xf]  ;;  %2054 = vmatpush.bf16.msrb.mxu2 %v3201_v22  ;;  %p3820_p7 = por %p3819_p6, %p3818_p5 }
  0x2d   : > { %2067 = vmatpush.bf16.msrb.mxu3 %v3329_v30 }
  0x2e   : > { %p3821_p9 = pnand %p3820_p7, %p3816_p3 }
  0x39   : > { %2767 = vmatmul.msk.bf16.gmra.mxu0 %vm514_vm2, %v3474_v32 }
  0x3a   : > { %2783 = vmatmul.msk.bf16.gmra.mxu1 %vm514_vm2, %v3474_v32 }
  0x3b   : > { %2799 = vmatmul.msk.bf16.gmra.mxu2 %vm514_vm2, %v3474_v32 }
  0x3c   : > { %2815 = vmatmul.msk.bf16.gmra.mxu3 %vm514_vm2, %v3474_v32  ;;  %v3559_v32 = vld [vmem:[#allocation6 + $0x1ec] sm:$0xf0] }
  0x49   : > { %2768 = vmatmul.msk.bf16.gmra.mxu0 %vm514_vm2, %v3475_v33 }
  0x4a   : > { %2784 = vmatmul.msk.bf16.gmra.mxu1 %vm514_vm2, %v3475_v33 }
  0x4b   : > { %2800 = vmatmul.msk.bf16.gmra.mxu2 %vm514_vm2, %v3475_v33 }
  0x4c   : > { %2816 = vmatmul.msk.bf16.gmra.mxu3 %vm514_vm2, %v3475_v33 }
  0x59   : > { %2769 = vmatmul.msk.bf16.gmra.mxu0 %vm514_vm2, %v3476_v34 }
  0x5a   : > { %2785 = vmatmul.msk.bf16.gmra.mxu1 %vm514_vm2, %v3476_v34 }
  0x5b   : > { %2801 = vmatmul.msk.bf16.gmra.mxu2 %vm514_vm2, %v3476_v34 }
  0x5c   : > { %2817 = vmatmul.msk.bf16.gmra.mxu3 %vm514_vm2, %v3476_v34 }
  0x69   : > { %2770 = vmatmul.msk.bf16.gmra.mxu0 %vm514_vm2, %v3477_v35 }
  0x6a   : > { %2786 = vmatmul.msk.bf16.gmra.mxu1 %vm514_vm2, %v3477_v35 }
  0x6b   : > { %2802 = vmatmul.msk.bf16.gmra.mxu2 %vm514_vm2, %v3477_v35 }
  0x6c   : > { %2818 = vmatmul.msk.bf16.gmra.mxu3 %vm514_vm2, %v3477_v35 }
  0x79   : > { %2771 = vmatmul.msk.bf16.gmra.mxu0 %vm514_vm2, %v3478_v36 }
  0x7a   : > { %2787 = vmatmul.msk.bf16.gmra.mxu1 %vm514_vm2, %v3478_v36 }
  0x7b   : > { %2803 = vmatmul.msk.bf16.gmra.mxu2 %vm514_vm2, %v3478_v36 }
  0x7c   : > { %2819 = vmatmul.msk.bf16.gmra.mxu3 %vm514_vm2, %v3478_v36  ;;  %v3073_v36 = vor.u32 %v3559_v32, %v3072_v31 }
  0x7e   : > { %2041 = vmatpush.bf16.msrb.mxu1 %v3073_v36  ;;  %v3184_v36 = vld [vmem:[#allocation6 + $0x2c0] sm:$0xf] }
  0x89   : > { %2772 = vmatmul.msk.bf16.gmra.mxu0 %vm514_vm2, %v3479_v37 }
  0x8a   : > { %2788 = vmatmul.msk.bf16.gmra.mxu1 %vm514_vm2, %v3479_v37 }
  0x8b   : > { %2804 = vmatmul.msk.bf16.gmra.mxu2 %vm514_vm2, %v3479_v37 }
  0x8c   : > { %2820 = vmatmul.msk.bf16.gmra.mxu3 %vm514_vm2, %v3479_v37 }
  0x99   : > { %2773 = vmatmul.msk.bf16.gmra.mxu0 %vm514_vm2, %v3480_v38 }
  0x9a   : > { %2789 = vmatmul.msk.bf16.gmra.mxu1 %vm514_vm2, %v3480_v38 }
  0x9b   : > { %2805 = vmatmul.msk.bf16.gmra.mxu2 %vm514_vm2, %v3480_v38 }
  0x9c   : > { %2821 = vmatmul.msk.bf16.gmra.mxu3 %vm514_vm2, %v3480_v38 }
  0xa6   : > { %v588_v41 = vpop.f32.mrf.mxu0 }
  0xa7   : > { %v677_v43 = vpop.f32.mrf.mxu1  ;;  %v589_v45 = vadd.f32 %v588_v41, %v4068_v42 }
  0xa8   : > { %v678_v47 = vadd.f32 %v677_v43, %v4071_v44 }
  0xa9   : > { %2774 = vmatmul.msk.bf16.gmra.mxu0 %vm514_vm2, %v3481_v39  ;;  %v935_v50 = vmax.f32 %v589_v45, 0.0 }
  0xaa   : > { %2790 = vmatmul.msk.bf16.gmra.mxu1 %vm514_vm2, %v3481_v39  ;;  %v936_v57 = vmax.f32 %v678_v47, 0.0 }
  0xab   : > { %2806 = vmatmul.msk.bf16.gmra.mxu2 %vm514_vm2, %v3481_v39 }
  0xac   : > { %2822 = vmatmul.msk.bf16.gmra.mxu3 %vm514_vm2, %v3481_v39 }
  0xae   : > { %v766_v46 = vpop.f32.mrf.mxu2  ;;  %v590_v49 = vpop.f32.mrf.mxu0 }
  0xaf   : > { %v855_v48 = vpop.f32.mrf.mxu3  ;;  %v591_v51 = vadd.f32 %v590_v49, %v4068_v42  ;;  %v679_v52 = vpop.f32.mrf.mxu1  ;;  %v767_v60 = vadd.f32 %v766_v46, %v4079_v53  ;;  %v3483_v49 = vld [vmem:[%s4022_s20 + $0x50] sm:$0xff] }
  0xb0   : > { %v680_v54 = vadd.f32 %v679_v52, %v4071_v44  ;;  %v856_v62 = vadd.f32 %v855_v48, %v4082_v55 }
  0xb1   : > { %v939_v56 = vmax.f32 %v591_v51, 0.0  ;;  %v937_v7 = vmax.f32 %v767_v60, 0.0 }
  0xb2   : > { %v940_v58 = vmax.f32 %v680_v54, 0.0  ;;  %v938_v10 = vmax.f32 %v856_v62, 0.0 }
  0xb3   : > { %v1064_v59 = vadd.f32 %v939_v56, %v935_v50 }
  0xb4   : > { %v1101_v61 = vadd.f32 %v940_v58, %v936_v57 }
  0xb6   : > { %v768_v63 = vpop.f32.mrf.mxu2  ;;  %v593_v3 = vpop.f32.mrf.mxu0 }
  0xb7   : > { %v769_v1 = vadd.f32 %v768_v63, %v4079_v53  ;;  %v857_v2 = vpop.f32.mrf.mxu3  ;;  %v594_v5 = vadd.f32 %v593_v3, %v4068_v42  ;;  %v682_v6 = vpop.f32.mrf.mxu1 }
  0xb8   : > { %v858_v4 = vadd.f32 %v857_v2, %v4082_v55  ;;  %v683_v9 = vadd.f32 %v682_v6, %v4071_v44 }
  0xb9   : > { %v941_v8 = vmax.f32 %v769_v1, 0.0  ;;  %v943_v12 = vmax.f32 %v594_v5, 0.0  ;;  %2775 = vmatmul.msk.bf16.gmra.mxu0 %vm514_vm2, %v3482_v0 }
  0xba   : > { %v942_v11 = vmax.f32 %v858_v4, 0.0  ;;  %v944_v14 = vmax.f32 %v683_v9, 0.0  ;;  %2791 = vmatmul.msk.bf16.gmra.mxu1 %vm514_vm2, %v3482_v0 }
  0xbb   : > { %v1138_v13 = vadd.f32 %v941_v8, %v937_v7  ;;  %2807 = vmatmul.msk.bf16.gmra.mxu2 %vm514_vm2, %v3482_v0  ;;  %v1065_v16 = vadd.f32 %v1064_v59, %v943_v12 }
  0xbc   : > { %v1175_v15 = vadd.f32 %v942_v11, %v938_v10  ;;  %2823 = vmatmul.msk.bf16.gmra.mxu3 %vm514_vm2, %v3482_v0  ;;  %v1102_v17 = vadd.f32 %v1101_v61, %v944_v14 }
  0xbe   : > { %v771_v21 = vpop.f32.mrf.mxu2  ;;  %v595_v28 = vpop.f32.mrf.mxu0 }
  0xbf   : > { %v772_v26 = vadd.f32 %v771_v21, %v4079_v53  ;;  %v860_v27 = vpop.f32.mrf.mxu3  ;;  %v596_v34 = vadd.f32 %v595_v28, %v4068_v42  ;;  %v684_v35 = vpop.f32.mrf.mxu1 }
  0xc0   : > { %v861_v33 = vadd.f32 %v860_v27, %v4082_v55  ;;  %v685_v38 = vadd.f32 %v684_v35, %v4071_v44 }
  0xc1   : > { %v945_v37 = vmax.f32 %v772_v26, 0.0  ;;  %v947_v40 = vmax.f32 %v596_v34, 0.0 }
  0xc2   : > { %v946_v39 = vmax.f32 %v861_v33, 0.0  ;;  %v948_v43 = vmax.f32 %v685_v38, 0.0  ;;  %v2928_v38 = vld [vmem:[#allocation6 + $0xc0] sm:$0xf] }
  0xc3   : > { %v1139_v41 = vadd.f32 %v1138_v13, %v945_v37  ;;  %v1066_v46 = vadd.f32 %v1065_v16, %v947_v40  ;;  %v3587_v37 = vld [vmem:[#allocation6 + $0x2cc] sm:$0xf0] }
  0xc4   : > { %v1176_v45 = vadd.f32 %v1175_v15, %v946_v39  ;;  %v1103_v47 = vadd.f32 %v1102_v17, %v948_v43  ;;  %v3185_v40 = vor.u32 %v3587_v37, %v3184_v36  ;;  %v3312_v43 = vld [vmem:[#allocation6 + $0x3c0] sm:$0xf] }
  0xc6   : > { %v773_v48 = vpop.f32.mrf.mxu2  ;;  %v598_v52 = vpop.f32.mrf.mxu0  ;;  %2055 = vmatpush.bf16.msrb.mxu2 %v3185_v40 }
  0xc7   : > { %v774_v50 = vadd.f32 %v773_v48, %v4079_v53  ;;  %v862_v51 = vpop.f32.mrf.mxu3  ;;  %v599_v56 = vadd.f32 %v598_v52, %v4068_v42  ;;  %v687_v57 = vpop.f32.mrf.mxu1  ;;  %v3555_v52 = vld [vmem:[#allocation6 + $0x1cc] sm:$0xf0] }
  0xc8   : > { %v863_v54 = vadd.f32 %v862_v51, %v4082_v55  ;;  %v688_v59 = vadd.f32 %v687_v57, %v4071_v44  ;;  %v3056_v51 = vld [vmem:[#allocation6 + $0x1c0] sm:$0xf] }
  0xc9   : > { %v949_v58 = vmax.f32 %v774_v50, 0.0  ;;  %v951_v61 = vmax.f32 %v599_v56, 0.0  ;;  %2776 = vmatmul.msk.bf16.gmra.mxu0 %vm514_vm2, %v3483_v49 }
  0xca   : > { %v950_v60 = vmax.f32 %v863_v54, 0.0  ;;  %v952_v63 = vmax.f32 %v688_v59, 0.0  ;;  %2792 = vmatmul.msk.bf16.gmra.mxu1 %vm514_vm2, %v3483_v49 }
  0xcb   : > { %v1140_v62 = vadd.f32 %v1139_v41, %v949_v58  ;;  %2808 = vmatmul.msk.bf16.gmra.mxu2 %vm514_vm2, %v3483_v49  ;;  %v1067_v1 = vadd.f32 %v1066_v46, %v951_v61  ;;  %v3523_v41 = vld [vmem:[#allocation6 + $0xcc] sm:$0xf0]  ;;  %v3057_v58 = vor.u32 %v3555_v52, %v3056_v51 }
  0xcc   : > { %v1177_v0 = vadd.f32 %v1176_v45, %v950_v60  ;;  %2824 = vmatmul.msk.bf16.gmra.mxu3 %vm514_vm2, %v3483_v49  ;;  %v1104_v2 = vadd.f32 %v1103_v47, %v952_v63  ;;  %v3619_v45 = vld [vmem:[#allocation6 + $0x3cc] sm:$0xf0]  ;;  %v2929_v49 = vor.u32 %v3523_v41, %v2928_v38 }
  0xcd   : > { %v3313_v50 = vor.u32 %v3619_v45, %v3312_v43  ;;  %2042 = vmatpush.bf16.msrb.mxu1 %v3057_v58  ;;  %v2912_v58 = vld [vmem:[#allocation6 + $0xa0] sm:$0xf] }
  0xce   : > { %v776_v3 = vpop.f32.mrf.mxu2  ;;  %v600_v6 = vpop.f32.mrf.mxu0  ;;  %2029 = vmatpush.bf16.msrb.mxu0 %v2929_v49 }
  0xcf   : > { %v777_v4 = vadd.f32 %v776_v3, %v4079_v53  ;;  %v865_v5 = vpop.f32.mrf.mxu3  ;;  %v601_v8 = vadd.f32 %v600_v6, %v4068_v42  ;;  %v689_v9 = vpop.f32.mrf.mxu1  ;;  %2068 = vmatpush.bf16.msrb.mxu3 %v3313_v50 }
  0xd0   : > { %v866_v7 = vadd.f32 %v865_v5, %v4082_v55  ;;  %v690_v11 = vadd.f32 %v689_v9, %v4071_v44  ;;  %v3485_v5 = vld [vmem:[%s4022_s20 + $0x60] sm:$0xff] }
  0xd1   : > { %v953_v10 = vmax.f32 %v777_v4, 0.0  ;;  %v955_v13 = vmax.f32 %v601_v8, 0.0 }
  0xd2   : > { %v954_v12 = vmax.f32 %v866_v7, 0.0  ;;  %v956_v15 = vmax.f32 %v690_v11, 0.0 }
  0xd3   : > { %v1141_v14 = vadd.f32 %v1140_v62, %v953_v10  ;;  %v1068_v17 = vadd.f32 %v1067_v1, %v955_v13 }
  0xd4   : > { %v1178_v16 = vadd.f32 %v1177_v0, %v954_v12  ;;  %v1105_v18 = vadd.f32 %v1104_v2, %v956_v15 }
  0xd6   : > { %v778_v19 = vpop.f32.mrf.mxu2  ;;  %v603_v23 = vpop.f32.mrf.mxu0 }
  0xd7   : > { %v779_v21 = vadd.f32 %v778_v19, %v4079_v53  ;;  %v867_v22 = vpop.f32.mrf.mxu3  ;;  %v604_v25 = vadd.f32 %v603_v23, %v4068_v42  ;;  %v692_v26 = vpop.f32.mrf.mxu1 }
  0xd8   : > { %v868_v24 = vadd.f32 %v867_v22, %v4082_v55  ;;  %v693_v28 = vadd.f32 %v692_v26, %v4071_v44 }
  0xd9   : > { %v957_v27 = vmax.f32 %v779_v21, 0.0  ;;  %v959_v30 = vmax.f32 %v604_v25, 0.0  ;;  %2777 = vmatmul.msk.bf16.gmra.mxu0 %vm514_vm2, %v3484_v20 }
  0xda   : > { %v958_v29 = vmax.f32 %v868_v24, 0.0  ;;  %v960_v32 = vmax.f32 %v693_v28, 0.0  ;;  %2793 = vmatmul.msk.bf16.gmra.mxu1 %vm514_vm2, %v3484_v20 }
  0xdb   : > { %v1142_v31 = vadd.f32 %v1141_v14, %v957_v27  ;;  %2809 = vmatmul.msk.bf16.gmra.mxu2 %vm514_vm2, %v3484_v20  ;;  %v1069_v34 = vadd.f32 %v1068_v17, %v959_v30 }
  0xdc   : > { %v1179_v33 = vadd.f32 %v1178_v16, %v958_v29  ;;  %2825 = vmatmul.msk.bf16.gmra.mxu3 %vm514_vm2, %v3484_v20  ;;  %v1106_v35 = vadd.f32 %v1105_v18, %v960_v32 }
  0xde   : > { %v781_v39 = vpop.f32.mrf.mxu2  ;;  %v605_v48 = vpop.f32.mrf.mxu0 }
  0xdf   : > { %v782_v46 = vadd.f32 %v781_v39, %v4079_v53  ;;  %v870_v47 = vpop.f32.mrf.mxu3  ;;  %v606_v56 = vadd.f32 %v605_v48, %v4068_v42  ;;  %v694_v57 = vpop.f32.mrf.mxu1 }
  0xe0   : > { %v871_v54 = vadd.f32 %v870_v47, %v4082_v55  ;;  %v695_v60 = vadd.f32 %v694_v57, %v4071_v44  ;;  %v3583_v57 = vld [vmem:[#allocation6 + $0x2ac] sm:$0xf0] }
  0xe1   : > { %v961_v59 = vmax.f32 %v782_v46, 0.0  ;;  %v963_v62 = vmax.f32 %v606_v56, 0.0  ;;  %v3168_v56 = vld [vmem:[#allocation6 + $0x2a0] sm:$0xf] }
  0xe2   : > { %v962_v61 = vmax.f32 %v871_v54, 0.0  ;;  %v964_v0 = vmax.f32 %v695_v60, 0.0  ;;  %v3169_v60 = vor.u32 %v3583_v57, %v3168_v56  ;;  %v3488_v57 = vld [vmem:[%s4022_s20 + $0x78] sm:$0xff] }
  0xe3   : > { %v1143_v63 = vadd.f32 %v1142_v31, %v961_v59  ;;  %v1070_v2 = vadd.f32 %v1069_v34, %v963_v62  ;;  %v3296_v62 = vld [vmem:[#allocation6 + $0x3a0] sm:$0xf] }
  0xe4   : > { %v1180_v1 = vadd.f32 %v1179_v33, %v962_v61  ;;  %v1107_v3 = vadd.f32 %v1106_v35, %v964_v0  ;;  %v3486_v35 = vld [vmem:[%s4022_s20 + $0x68] sm:$0xff]  ;;  %v3519_v61 = vld [vmem:[#allocation6 + $0xac] sm:$0xf0]  ;;  %2056 = vmatpush.bf16.msrb.mxu2 %v3169_v60 }
  0xe6   : > { %v783_v4 = vpop.f32.mrf.mxu2  ;;  %v608_v8 = vpop.f32.mrf.mxu0 }
  0xe7   : > { %v784_v6 = vadd.f32 %v783_v4, %v4079_v53  ;;  %v872_v7 = vpop.f32.mrf.mxu3  ;;  %v609_v10 = vadd.f32 %v608_v8, %v4068_v42  ;;  %v697_v11 = vpop.f32.mrf.mxu1 }
  0xe8   : > { %v873_v9 = vadd.f32 %v872_v7, %v4082_v55  ;;  %v698_v13 = vadd.f32 %v697_v11, %v4071_v44 }
  0xe9   : > { %v965_v12 = vmax.f32 %v784_v6, 0.0  ;;  %v967_v15 = vmax.f32 %v609_v10, 0.0  ;;  %2778 = vmatmul.msk.bf16.gmra.mxu0 %vm514_vm2, %v3485_v5  ;;  %v3551_v6 = vld [vmem:[#allocation6 + $0x1ac] sm:$0xf0] }
  0xea   : > { %v966_v14 = vmax.f32 %v873_v9, 0.0  ;;  %v968_v17 = vmax.f32 %v698_v13, 0.0  ;;  %2794 = vmatmul.msk.bf16.gmra.mxu1 %vm514_vm2, %v3485_v5 }
  0xeb   : > { %v1144_v16 = vadd.f32 %v1143_v63, %v965_v12  ;;  %2810 = vmatmul.msk.bf16.gmra.mxu2 %vm514_vm2, %v3485_v5  ;;  %v1071_v19 = vadd.f32 %v1070_v2, %v967_v15  ;;  %v3615_v63 = vld [vmem:[#allocation6 + $0x3ac] sm:$0xf0] }
  0xec   : > { %v1181_v18 = vadd.f32 %v1180_v1, %v966_v14  ;;  %2826 = vmatmul.msk.bf16.gmra.mxu3 %vm514_vm2, %v3485_v5  ;;  %v1108_v20 = vadd.f32 %v1107_v3, %v968_v17  ;;  %v2913_v3 = vor.u32 %v3519_v61, %v2912_v58  ;;  %v3297_v4 = vor.u32 %v3615_v63, %v3296_v62  ;;  %v3040_v5 = vld [vmem:[#allocation6 + $0x1a0] sm:$0xf] }
  0xed   : > { %v3041_v9 = vor.u32 %v3551_v6, %v3040_v5 }
  0xee   : > { %v786_v21 = vpop.f32.mrf.mxu2  ;;  %v610_v24 = vpop.f32.mrf.mxu0  ;;  %2030 = vmatpush.bf16.msrb.mxu0 %v2913_v3  ;;  %2069 = vmatpush.bf16.msrb.mxu3 %v3297_v4 }
  0xef   : > { %v787_v22 = vadd.f32 %v786_v21, %v4079_v53  ;;  %v875_v23 = vpop.f32.mrf.mxu3  ;;  %v699_v26 = vpop.f32.mrf.mxu1  ;;  %v611_v29 = vadd.f32 %v610_v24, %v4068_v42  ;;  %2043 = vmatpush.bf16.msrb.mxu1 %v3041_v9 }
  0xf0   : > { %v876_v25 = vadd.f32 %v875_v23, %v4082_v55  ;;  %v700_v31 = vadd.f32 %v699_v26, %v4071_v44 }
  0xf1   : > { %v969_v27 = vmax.f32 %v787_v22, 0.0  ;;  %v971_v33 = vmax.f32 %v611_v29, 0.0 }
  0xf2   : > { %v970_v28 = vmax.f32 %v876_v25, 0.0  ;;  %v972_v36 = vmax.f32 %v700_v31, 0.0 }
  0xf3   : > { %v1145_v30 = vadd.f32 %v1144_v16, %v969_v27  ;;  %v1072_v46 = vadd.f32 %v1071_v19, %v971_v33 }
  0xf4   : > { %v1182_v32 = vadd.f32 %v1181_v18, %v970_v28  ;;  %v1109_v48 = vadd.f32 %v1108_v20, %v972_v36  ;;  %v3487_v20 = vld [vmem:[%s4022_s20 + $0x70] sm:$0xff]  ;;  %s2556_s20 = scalar_lea.sflag [#allocation5], %s326_s10 }
  0xf6   : > { %v788_v34 = vpop.f32.mrf.mxu2  ;;  %v613_v38 = vpop.f32.mrf.mxu0 }
  0xf7   : > { %v877_v37 = vpop.f32.mrf.mxu3  ;;  %v789_v39 = vadd.f32 %v788_v34, %v4079_v53  ;;  %v614_v41 = vadd.f32 %v613_v38, %v4068_v42  ;;  %v702_v43 = vpop.f32.mrf.mxu1 }
  0xf8   : > { %v878_v40 = vadd.f32 %v877_v37, %v4082_v55  ;;  %v703_v45 = vadd.f32 %v702_v43, %v4071_v44 }
  0xf9   : > { %v975_v47 = vmax.f32 %v614_v41, 0.0  ;;  %2779 = vmatmul.msk.bf16.gmra.mxu0 %vm514_vm2, %v3486_v35  ;;  %v973_v50 = vmax.f32 %v789_v39, 0.0 }
  0xfa   : > { %v976_v49 = vmax.f32 %v703_v45, 0.0  ;;  %2795 = vmatmul.msk.bf16.gmra.mxu1 %vm514_vm2, %v3486_v35  ;;  %v974_v51 = vmax.f32 %v878_v40, 0.0 }
  0xfb   : > { %2811 = vmatmul.msk.bf16.gmra.mxu2 %vm514_vm2, %v3486_v35  ;;  %v1073_v52 = vadd.f32 %v1072_v46, %v975_v47  ;;  %v1146_v10 = vadd.f32 %v1145_v30, %v973_v50 }
  0xfc   : > { %2827 = vmatmul.msk.bf16.gmra.mxu3 %vm514_vm2, %v3486_v35  ;;  %v1110_v54 = vadd.f32 %v1109_v48, %v976_v49  ;;  %v1183_v12 = vadd.f32 %v1182_v32, %v974_v51 }
  0xfe   : > { %v791_v59 = vpop.f32.mrf.mxu2  ;;  %v615_v2 = vpop.f32.mrf.mxu0 }
  0xff   : > { %v792_v0 = vadd.f32 %v791_v59, %v4079_v53  ;;  %v880_v1 = vpop.f32.mrf.mxu3  ;;  %v704_v8 = vpop.f32.mrf.mxu1  ;;  %v616_v14 = vadd.f32 %v615_v2, %v4068_v42 }
 0x100   : > { %v881_v7 = vadd.f32 %v880_v1, %v4082_v55  ;;  %v705_v16 = vadd.f32 %v704_v8, %v4071_v44 }
 0x101   : > { %v977_v11 = vmax.f32 %v792_v0, 0.0  ;;  %v979_v18 = vmax.f32 %v616_v14, 0.0 }
 0x102   : > { %v978_v13 = vmax.f32 %v881_v7, 0.0  ;;  %v980_v21 = vmax.f32 %v705_v16, 0.0  ;;  %v3280_v16 = vld [vmem:[#allocation6 + $0x380] sm:$0xf] }
 0x103   : > { %v1147_v15 = vadd.f32 %v1146_v10, %v977_v11  ;;  %v1074_v28 = vadd.f32 %v1073_v52, %v979_v18  ;;  %v3152_v10 = vld [vmem:[#allocation6 + $0x280] sm:$0xf]  ;;  %v3579_v11 = vld [vmem:[#allocation6 + $0x28c] sm:$0xf0] }
 0x104   : > { %v1184_v17 = vadd.f32 %v1183_v12, %v978_v13  ;;  %v1111_v31 = vadd.f32 %v1110_v54, %v980_v21  ;;  %v2896_v12 = vld [vmem:[#allocation6 + $0x80] sm:$0xf]  ;;  %v3153_v14 = vor.u32 %v3579_v11, %v3152_v10 }
 0x106   : > { %v793_v19 = vpop.f32.mrf.mxu2  ;;  %v618_v23 = vpop.f32.mrf.mxu0  ;;  %2057 = vmatpush.bf16.msrb.mxu2 %v3153_v14 }
 0x107   : > { %v882_v22 = vpop.f32.mrf.mxu3  ;;  %v619_v24 = vadd.f32 %v618_v23, %v4068_v42  ;;  %v707_v25 = vpop.f32.mrf.mxu1  ;;  %v794_v26 = vadd.f32 %v793_v19, %v4079_v53  ;;  %v3024_v23 = vld [vmem:[#allocation6 + $0x180] sm:$0xf] }
 0x108   : > { %v708_v27 = vadd.f32 %v707_v25, %v4071_v44  ;;  %v883_v29 = vadd.f32 %v882_v22, %v4082_v55 }
 0x109   : > { %v983_v30 = vmax.f32 %v619_v24, 0.0  ;;  %2780 = vmatmul.msk.bf16.gmra.mxu0 %vm514_vm2, %v3487_v20  ;;  %v981_v34 = vmax.f32 %v794_v26, 0.0  ;;  %v3547_v24 = vld [vmem:[#allocation6 + $0x18c] sm:$0xf0] }
 0x10a   : > { %v984_v32 = vmax.f32 %v708_v27, 0.0  ;;  %2796 = vmatmul.msk.bf16.gmra.mxu1 %vm514_vm2, %v3487_v20  ;;  %v982_v36 = vmax.f32 %v883_v29, 0.0  ;;  %v3025_v27 = vor.u32 %v3547_v24, %v3024_v23 }
 0x10b   : > { %2812 = vmatmul.msk.bf16.gmra.mxu2 %vm514_vm2, %v3487_v20  ;;  %v1075_v33 = vadd.f32 %v1074_v28, %v983_v30  ;;  %v1148_v45 = vadd.f32 %v1147_v15, %v981_v34  ;;  %v3515_v15 = vld [vmem:[#allocation6 + $0x8c] sm:$0xf0] }
 0x10c   : > { %2828 = vmatmul.msk.bf16.gmra.mxu3 %vm514_vm2, %v3487_v20  ;;  %v1112_v35 = vadd.f32 %v1111_v31, %v984_v32  ;;  %v1185_v47 = vadd.f32 %v1184_v17, %v982_v36  ;;  %v3611_v17 = vld [vmem:[#allocation6 + $0x38c] sm:$0xf0]  ;;  %v2897_v21 = vor.u32 %v3515_v15, %v2896_v12  ;;  %2044 = vmatpush.bf16.msrb.mxu1 %v3025_v27 }
 0x10d   : > { %v3281_v22 = vor.u32 %v3611_v17, %v3280_v16  ;;  %v3575_v27 = vld [vmem:[#allocation6 + $0x26c] sm:$0xf0] }
 0x10e   : > { %v796_v37 = vpop.f32.mrf.mxu2  ;;  %v620_v40 = vpop.f32.mrf.mxu0  ;;  %2031 = vmatpush.bf16.msrb.mxu0 %v2897_v21 }
 0x10f   : > { %v797_v38 = vadd.f32 %v796_v37, %v4079_v53  ;;  %v885_v39 = vpop.f32.mrf.mxu3  ;;  %v709_v43 = vpop.f32.mrf.mxu1  ;;  %v621_v49 = vadd.f32 %v620_v40, %v4068_v42  ;;  %2070 = vmatpush.bf16.msrb.mxu3 %v3281_v22 }
 0x110   : > { %v886_v41 = vadd.f32 %v885_v39, %v4082_v55  ;;  %v710_v51 = vadd.f32 %v709_v43, %v4071_v44 }
 0x111   : > { %v985_v46 = vmax.f32 %v797_v38, 0.0  ;;  %v987_v54 = vmax.f32 %v621_v49, 0.0 }
 0x112   : > { %v986_v48 = vmax.f32 %v886_v41, 0.0  ;;  %v988_v58 = vmax.f32 %v710_v51, 0.0 }
 0x113   : > { %v1149_v50 = vadd.f32 %v1148_v45, %v985_v46  ;;  %v1076_v2 = vadd.f32 %v1075_v33, %v987_v54 }
 0x114   : > { %v1186_v52 = vadd.f32 %v1185_v47, %v986_v48  ;;  %v1113_v4 = vadd.f32 %v1112_v35, %v988_v58 }
 0x116   : > { %v798_v56 = vpop.f32.mrf.mxu2  ;;  %v623_v60 = vpop.f32.mrf.mxu0 }
 0x117   : > { %v887_v59 = vpop.f32.mrf.mxu3  ;;  %v799_v61 = vadd.f32 %v798_v56, %v4079_v53  ;;  %v624_v63 = vadd.f32 %v623_v60, %v4068_v42  ;;  %v712_v0 = vpop.f32.mrf.mxu1 }
 0x118   : > { %v888_v62 = vadd.f32 %v887_v59, %v4082_v55  ;;  %v713_v1 = vadd.f32 %v712_v0, %v4071_v44 }
 0x119   : > { %v991_v3 = vmax.f32 %v624_v63, 0.0  ;;  %2781 = vmatmul.msk.bf16.gmra.mxu0 %vm514_vm2, %v3488_v57  ;;  %v989_v6 = vmax.f32 %v799_v61, 0.0 }
 0x11a   : > { %v992_v5 = vmax.f32 %v713_v1, 0.0  ;;  %2797 = vmatmul.msk.bf16.gmra.mxu1 %vm514_vm2, %v3488_v57  ;;  %v990_v7 = vmax.f32 %v888_v62, 0.0 }
 0x11b   : > { %2813 = vmatmul.msk.bf16.gmra.mxu2 %vm514_vm2, %v3488_v57  ;;  %v1077_v8 = vadd.f32 %v1076_v2, %v991_v3  ;;  %v1150_v28 = vadd.f32 %v1149_v50, %v989_v6 }
 0x11c   : > { %2829 = vmatmul.msk.bf16.gmra.mxu3 %vm514_vm2, %v3488_v57  ;;  %v1114_v9 = vadd.f32 %v1113_v4, %v992_v5  ;;  %v1187_v30 = vadd.f32 %v1186_v52, %v990_v7 }
 0x11e   : > { %v801_v13 = vpop.f32.mrf.mxu2  ;;  %v625_v20 = vpop.f32.mrf.mxu0 }
 0x11f   : > { %v802_v18 = vadd.f32 %v801_v13, %v4079_v53  ;;  %v890_v19 = vpop.f32.mrf.mxu3  ;;  %v714_v26 = vpop.f32.mrf.mxu1  ;;  %v626_v32 = vadd.f32 %v625_v20, %v4068_v42 }
 0x120   : > { %v891_v25 = vadd.f32 %v890_v19, %v4082_v55  ;;  %v715_v34 = vadd.f32 %v714_v26, %v4071_v44  ;;  %v3136_v26 = vld [vmem:[#allocation6 + $0x260] sm:$0xf] }
 0x121   : > { %v993_v29 = vmax.f32 %v802_v18, 0.0  ;;  %v995_v36 = vmax.f32 %v626_v32, 0.0  ;;  %v3264_v32 = vld [vmem:[#allocation6 + $0x360] sm:$0xf] }
 0x122   : > { %v994_v31 = vmax.f32 %v891_v25, 0.0  ;;  %v996_v38 = vmax.f32 %v715_v34, 0.0 }
 0x123   : > { %v1151_v33 = vadd.f32 %v1150_v28, %v993_v29  ;;  %v1078_v47 = vadd.f32 %v1077_v8, %v995_v36  ;;  %v2880_v28 = vld [vmem:[#allocation6 + $0x60] sm:$0xf] }
 0x124   : > { %v1188_v35 = vadd.f32 %v1187_v30, %v994_v31  ;;  %v1115_v50 = vadd.f32 %v1114_v9, %v996_v38  ;;  %v3137_v30 = vor.u32 %v3575_v27, %v3136_v26  ;;  %v3511_v31 = vld [vmem:[#allocation6 + $0x6c] sm:$0xf0]  ;;  %v3120_v26 = vld [vmem:[#allocation6 + $0x240] sm:$0xf] }
 0x125   : > { %v3571_v27 = vld [vmem:[#allocation6 + $0x24c] sm:$0xf0] }
 0x126   : > { %v803_v37 = vpop.f32.mrf.mxu2  ;;  %v628_v40 = vpop.f32.mrf.mxu0  ;;  %2058 = vmatpush.bf16.msrb.mxu2 %v3137_v30  ;;  %v3121_v30 = vor.u32 %v3571_v27, %v3120_v26 }
 0x127   : > { %v892_v39 = vpop.f32.mrf.mxu3  ;;  %v629_v41 = vadd.f32 %v628_v40, %v4068_v42  ;;  %v717_v43 = vpop.f32.mrf.mxu1  ;;  %v804_v45 = vadd.f32 %v803_v37, %v4079_v53  ;;  %v2881_v37 = vor.u32 %v3511_v31, %v2880_v28  ;;  %v3543_v40 = vld [vmem:[#allocation6 + $0x16c] sm:$0xf0]  ;;  %v2864_v28 = vld [vmem:[#allocation6 + $0x40] sm:$0xf] }
 0x128   : > { %v718_v46 = vadd.f32 %v717_v43, %v4071_v44  ;;  %v893_v48 = vadd.f32 %v892_v39, %v4082_v55  ;;  %v3008_v39 = vld [vmem:[#allocation6 + $0x160] sm:$0xf]  ;;  %v3507_v31 = vld [vmem:[#allocation6 + $0x4c] sm:$0xf0] }
 0x129   : > { %v999_v49 = vmax.f32 %v629_v41, 0.0  ;;  %v997_v54 = vmax.f32 %v804_v45, 0.0  ;;  %2032 = vmatpush.bf16.msrb.mxu0 %v2881_v37 }
 0x12a   : > { %v1000_v51 = vmax.f32 %v718_v46, 0.0  ;;  %v998_v57 = vmax.f32 %v893_v48, 0.0  ;;  %v3009_v46 = vor.u32 %v3543_v40, %v3008_v39  ;;  %v3539_v39 = vld [vmem:[#allocation6 + $0x14c] sm:$0xf0]  ;;  %2059 = vmatpush.bf16.msrb.mxu2 %v3121_v30 }
 0x12b   : > { %v1079_v52 = vadd.f32 %v1078_v47, %v999_v49  ;;  %v1152_v0 = vadd.f32 %v1151_v33, %v997_v54  ;;  %v3607_v33 = vld [vmem:[#allocation6 + $0x36c] sm:$0xf0] }
 0x12c   : > { %v1116_v56 = vadd.f32 %v1115_v50, %v1000_v51  ;;  %v1189_v2 = vadd.f32 %v1188_v35, %v998_v57  ;;  %v3265_v38 = vor.u32 %v3607_v33, %v3264_v32  ;;  %2045 = vmatpush.bf16.msrb.mxu1 %v3009_v46  ;;  %v3248_v32 = vld [vmem:[#allocation6 + $0x340] sm:$0xf]  ;;  %v3603_v33 = vld [vmem:[#allocation6 + $0x34c] sm:$0xf0] }
 0x12d   : > { %v3249_v37 = vor.u32 %v3603_v33, %v3248_v32 }
 0x12e   : > { %v806_v58 = vpop.f32.mrf.mxu2  ;;  %v630_v61 = vpop.f32.mrf.mxu0  ;;  %2071 = vmatpush.bf16.msrb.mxu3 %v3265_v38  ;;  %v2992_v38 = vld [vmem:[#allocation6 + $0x140] sm:$0xf] }
 0x12f   : > { %v807_v59 = vadd.f32 %v806_v58, %v4079_v53  ;;  %v895_v60 = vpop.f32.mrf.mxu3  ;;  %v719_v63 = vpop.f32.mrf.mxu1  ;;  %v631_v4 = vadd.f32 %v630_v61, %v4068_v42 }
 0x130   : > { %v896_v62 = vadd.f32 %v895_v60, %v4082_v55  ;;  %v720_v6 = vadd.f32 %v719_v63, %v4071_v44 }
 0x131   : > { %v1001_v1 = vmax.f32 %v807_v59, 0.0  ;;  %v1003_v8 = vmax.f32 %v631_v4, 0.0 }
 0x132   : > { %v1002_v3 = vmax.f32 %v896_v62, 0.0  ;;  %v1004_v10 = vmax.f32 %v720_v6, 0.0  ;;  %2072 = vmatpush.bf16.msrb.mxu3 %v3249_v37 }
 0x133   : > { %v1153_v5 = vadd.f32 %v1152_v0, %v1001_v1  ;;  %v1080_v18 = vadd.f32 %v1079_v52, %v1003_v8 }
 0x134   : > { %v1190_v7 = vadd.f32 %v1189_v2, %v1002_v3  ;;  %v1117_v20 = vadd.f32 %v1116_v56, %v1004_v10 }
 0x136   : > { %v808_v9 = vpop.f32.mrf.mxu2  ;;  %v633_v12 = vpop.f32.mrf.mxu0 }
 0x137   : > { %v897_v11 = vpop.f32.mrf.mxu3  ;;  %v809_v13 = vadd.f32 %v808_v9, %v4079_v53  ;;  %v634_v15 = vadd.f32 %v633_v12, %v4068_v42  ;;  %v722_v16 = vpop.f32.mrf.mxu1 }
 0x138   : > { %v898_v14 = vadd.f32 %v897_v11, %v4082_v55  ;;  %v723_v17 = vadd.f32 %v722_v16, %v4071_v44 }
 0x139   : > { %v1007_v19 = vmax.f32 %v634_v15, 0.0  ;;  %v1005_v22 = vmax.f32 %v809_v13, 0.0 }
 0x13a   : > { %v1008_v21 = vmax.f32 %v723_v17, 0.0  ;;  %v1006_v23 = vmax.f32 %v898_v14, 0.0 }
 0x13b   : > { %v1081_v24 = vadd.f32 %v1080_v18, %v1007_v19  ;;  %v1154_v47 = vadd.f32 %v1153_v5, %v1005_v22 }
 0x13c   : > { %v1118_v25 = vadd.f32 %v1117_v20, %v1008_v21  ;;  %v1191_v50 = vadd.f32 %v1190_v7, %v1006_v23 }
 0x13e   : > { %v811_v29 = vpop.f32.mrf.mxu2  ;;  %v635_v36 = vpop.f32.mrf.mxu0 }
 0x13f   : > { %v812_v34 = vadd.f32 %v811_v29, %v4079_v53  ;;  %v900_v35 = vpop.f32.mrf.mxu3  ;;  %v636_v43 = vadd.f32 %v635_v36, %v4068_v42  ;;  %v724_v45 = vpop.f32.mrf.mxu1  ;;  %v2865_v36 = vor.u32 %v3507_v31, %v2864_v28 }
 0x140   : > { %v901_v41 = vadd.f32 %v900_v35, %v4082_v55  ;;  %v725_v49 = vadd.f32 %v724_v45, %v4071_v44 }
 0x141   : > { %v1009_v48 = vmax.f32 %v812_v34, 0.0  ;;  %v1011_v52 = vmax.f32 %v636_v43, 0.0  ;;  %2033 = vmatpush.bf16.msrb.mxu0 %v2865_v36 }
 0x142   : > { %v1010_v51 = vmax.f32 %v901_v41, 0.0  ;;  %v1012_v56 = vmax.f32 %v725_v49, 0.0  ;;  %v2993_v41 = vor.u32 %v3539_v39, %v2992_v38 }
 0x143   : > { %v1155_v54 = vadd.f32 %v1154_v47, %v1009_v48  ;;  %v1082_v58 = vadd.f32 %v1081_v24, %v1011_v52 }
 0x144   : > { %v1192_v57 = vadd.f32 %v1191_v50, %v1010_v51  ;;  %v1119_v59 = vadd.f32 %v1118_v25, %v1012_v56  ;;  %2046 = vmatpush.bf16.msrb.mxu1 %v2993_v41 }
 0x146   : > { %v813_v60 = vpop.f32.mrf.mxu2  ;;  %v638_v63 = vpop.f32.mrf.mxu0 }
 0x147   : > { %v814_v61 = vadd.f32 %v813_v60, %v4079_v53  ;;  %v902_v62 = vpop.f32.mrf.mxu3  ;;  %v639_v1 = vadd.f32 %v638_v63, %v4068_v42  ;;  %v727_v2 = vpop.f32.mrf.mxu1 }
 0x148   : > { %v903_v0 = vadd.f32 %v902_v62, %v4082_v55  ;;  %v728_v4 = vadd.f32 %v727_v2, %v4071_v44 }
 0x149   : > { %v1013_v3 = vmax.f32 %v814_v61, 0.0  ;;  %v1015_v6 = vmax.f32 %v639_v1, 0.0 }
 0x14a   : > { %v1014_v5 = vmax.f32 %v903_v0, 0.0  ;;  %v1016_v8 = vmax.f32 %v728_v4, 0.0 }
 0x14b   : > { %v1156_v7 = vadd.f32 %v1155_v54, %v1013_v3  ;;  %v4197_v10 = vadd.f32 %v1082_v58, %v1015_v6  ;;  %v3567_v6 = vld [vmem:[#allocation6 + $0x22c] sm:$0xf0] }
 0x14c   : > { %v1193_v9 = vadd.f32 %v1192_v57, %v1014_v5  ;;  %v4199_v11 = vadd.f32 %v1119_v59, %v1016_v8  ;;  %v3104_v5 = vld [vmem:[#allocation6 + $0x220] sm:$0xf] }
 0x14e   : > { %v816_v12 = vpop.f32.mrf.mxu2  ;;  %v640_v15 = vpop.f32.mrf.mxu0 }
 0x14f   : > { %v817_v13 = vadd.f32 %v816_v12, %v4079_v53  ;;  %v905_v14 = vpop.f32.mrf.mxu3  ;;  %v729_v17 = vpop.f32.mrf.mxu1  ;;  %v641_v54 = vadd.f32 %v640_v15, %v4068_v42  ;;  %v3503_v12 = vld [vmem:[#allocation6 + $0x2c] sm:$0xf0] }
 0x150   : > { %v906_v16 = vadd.f32 %v905_v14, %v4082_v55  ;;  %v730_v58 = vadd.f32 %v729_v17, %v4071_v44  ;;  %v3599_v14 = vld [vmem:[#allocation6 + $0x32c] sm:$0xf0] }
 0x151   : > { %v1017_v18 = vmax.f32 %v817_v13, 0.0  ;;  %v1019_v61 = vmax.f32 %v641_v54, 0.0  ;;  %v3232_v13 = vld [vmem:[#allocation6 + $0x320] sm:$0xf] }
 0x152   : > { %v1018_v19 = vmax.f32 %v906_v16, 0.0  ;;  %v1020_v0 = vmax.f32 %v730_v58, 0.0 }
 0x153   : > { %v4203_v20 = vadd.f32 %v1156_v7, %v1017_v18  ;;  %v2848_v7 = vld [vmem:[#allocation6 + $0x20] sm:$0xf]  ;;  %v1084_v30 = vadd.f32 %v4197_v10, %v1019_v61 }
 0x154   : > { %v4205_v21 = vadd.f32 %v1193_v9, %v1018_v19  ;;  %v3105_v9 = vor.u32 %v3567_v6, %v3104_v5  ;;  %v2849_v19 = vor.u32 %v3503_v12, %v2848_v7  ;;  %v1121_v33 = vadd.f32 %v4199_v11, %v1020_v0 }
 0x156   : > { %v818_v22 = vpop.f32.mrf.mxu2  ;;  %v643_v24 = vpop.f32.mrf.mxu0  ;;  %2060 = vmatpush.bf16.msrb.mxu2 %v3105_v9  ;;  %2034 = vmatpush.bf16.msrb.mxu0 %v2849_v19  ;;  %v2832_v19 = vld [vmem:[#allocation6] sm:$0xf] }
 0x157   : > { %v907_v23 = vpop.f32.mrf.mxu3  ;;  %v732_v25 = vpop.f32.mrf.mxu1  ;;  %v819_v59 = vadd.f32 %v818_v22, %v4079_v53  ;;  %v644_v63 = vadd.f32 %v643_v24, %v4068_v42  ;;  %v3233_v22 = vor.u32 %v3599_v14, %v3232_v13  ;;  %v3535_v24 = vld [vmem:[#allocation6 + $0x12c] sm:$0xf0] }
 0x158   : > { %v908_v62 = vadd.f32 %v907_v23, %v4082_v55  ;;  %v733_v2 = vadd.f32 %v732_v25, %v4071_v44  ;;  %v2976_v23 = vld [vmem:[#allocation6 + $0x120] sm:$0xf] }
 0x159   : > { %v1021_v1 = vmax.f32 %v819_v59, 0.0  ;;  %v1023_v16 = vmax.f32 %v644_v63, 0.0  ;;  %2073 = vmatpush.bf16.msrb.mxu3 %v3233_v22  ;;  %v3499_v22 = vld [vmem:[#allocation6 + $0xc] sm:$0xf0] }
 0x15a   : > { %v1022_v15 = vmax.f32 %v908_v62, 0.0  ;;  %v1024_v25 = vmax.f32 %v733_v2, 0.0 }
 0x15b   : > { %v1085_v38 = vadd.f32 %v1084_v30, %v1023_v16  ;;  %v3531_v30 = vld [vmem:[#allocation6 + $0x10c] sm:$0xf0] }
 0x15c   : > { %v1122_v39 = vadd.f32 %v1121_v33, %v1024_v25 }
 0x15e   : > { %v821_v29 = vpop.f32.mrf.mxu2  ;;  %v645_v35 = vpop.f32.mrf.mxu0 }
 0x15f   : > { %v910_v34 = vpop.f32.mrf.mxu3  ;;  %v734_v40 = vpop.f32.mrf.mxu1  ;;  %v822_v3 = vadd.f32 %v821_v29, %v4079_v53  ;;  %v646_v27 = vadd.f32 %v645_v35, %v4068_v42  ;;  %v2977_v29 = vor.u32 %v3535_v24, %v2976_v23  ;;  %v1195_v35 = vadd.f32 %v4205_v21, %v1022_v15  ;;  %v2960_v23 = vld [vmem:[#allocation6 + $0x100] sm:$0xf] }
 0x160   : > { %v911_v4 = vadd.f32 %v910_v34, %v4082_v55  ;;  %v735_v32 = vadd.f32 %v734_v40, %v4071_v44  ;;  %v1158_v34 = vadd.f32 %v4203_v20, %v1021_v1 }
 0x161   : > { %v1025_v26 = vmax.f32 %v822_v3, 0.0  ;;  %2047 = vmatpush.bf16.msrb.mxu1 %v2977_v29  ;;  %v1027_v10 = vmax.f32 %v646_v27, 0.0  ;;  %v2833_v29 = vor.u32 %v3499_v22, %v2832_v19 }
 0x162   : > { %v1026_v31 = vmax.f32 %v911_v4, 0.0  ;;  %v1028_v58 = vmax.f32 %v735_v32, 0.0  ;;  %v3563_v32 = vld [vmem:[#allocation6 + $0x20c] sm:$0xf0] }
 0x163   : > { %v1159_v41 = vadd.f32 %v1158_v34, %v1025_v26  ;;  %v1086_v2 = vadd.f32 %v1085_v38, %v1027_v10  ;;  %2035 = vmatpush.bf16.msrb.mxu0 %v2833_v29 }
 0x164   : > { %v1196_v54 = vadd.f32 %v1195_v35, %v1026_v31  ;;  %v3088_v31 = vld [vmem:[#allocation6 + $0x200] sm:$0xf]  ;;  %v2961_v35 = vor.u32 %v3531_v30, %v2960_v23  ;;  %v3890_v23 = vmov 0.0  }
 0x165   : > { %v3089_v38 = vor.u32 %v3563_v32, %v3088_v31 }
 0x166   : > { %v823_v43 = vpop.f32.mrf.mxu2  ;;  %v648_v46 = vpop.f32.mrf.mxu0  ;;  %2048 = vmatpush.bf16.msrb.mxu1 %v2961_v35  ;;  %v3042_v35 = vld [vmem:[#allocation6 + $0x1b0] sm:$0xf0] }
 0x167   : > { %v912_v45 = vpop.f32.mrf.mxu3  ;;  %v737_v47 = vpop.f32.mrf.mxu1  ;;  %v824_v36 = vadd.f32 %v823_v43, %v4079_v53  ;;  %v649_v40 = vadd.f32 %v648_v46, %v4068_v42  ;;  %2061 = vmatpush.bf16.msrb.mxu2 %v3089_v38 }
 0x168   : > { %v913_v37 = vadd.f32 %v912_v45, %v4082_v55  ;;  %v738_v59 = vadd.f32 %v737_v47, %v4071_v44 }
 0x169   : > { %v1029_v11 = vmax.f32 %v824_v36, 0.0  ;;  %v1031_v3 = vmax.f32 %v649_v40, 0.0 }
 0x16a   : > { %v1030_v61 = vmax.f32 %v913_v37, 0.0 }
 0x16b   : > { %v1160_v4 = vadd.f32 %v1159_v41, %v1029_v11  ;;  %v1087_v16 = vadd.f32 %v1086_v2, %v1031_v3  ;;  %v3525_v41 = vld [vmem:[#allocation6 + $0xe4] sm:$0xf]  ;;  %v2946_v11 = vld [vmem:[#allocation6 + $0xf0] sm:$0xf0] }
 0x16c   : > { %v1197_v5 = vadd.f32 %v1196_v54, %v1030_v61  ;;  %v3557_v61 = vld [vmem:[#allocation6 + $0x1e4] sm:$0xf] }
 0x16e   : > { %v826_v48 = vpop.f32.mrf.mxu2  ;;  %v4207_v50 = vpop.f32.mrf.mxu0 }
 0x16f   : > { %v915_v49 = vpop.f32.mrf.mxu3  ;;  %v4209_v51 = vpop.f32.mrf.mxu1  ;;  %v827_v20 = vadd.f32 %v826_v48, %v4079_v53  ;;  %v651_v21 = vadd.f32 %v4207_v50, %v4068_v42 }
 0x170   : > { %v916_v43 = vadd.f32 %v915_v49, %v4082_v55  ;;  %v740_v62 = vadd.f32 %v4209_v51, %v4071_v44 }
 0x171   : > { %v1033_v6 = vmax.f32 %v827_v20, 0.0  ;;  %v1035_v9 = vmax.f32 %v651_v21, 0.0 }
 0x172   : > { %v1034_v7 = vmax.f32 %v916_v43, 0.0  ;;  %v2949_v43 = vor.u32 %v3525_v41, %v2946_v11 }
 0x173   : > { %v1161_v24 = vadd.f32 %v1160_v4, %v1033_v6  ;;  %v1088_v10 = vadd.f32 %v1087_v16, %v1035_v9  ;;  %v3521_v4 = vld [vmem:[#allocation6 + $0xc4] sm:$0xf] }
 0x174   : > { %v1198_v25 = vadd.f32 %v1197_v5, %v1034_v7  ;;  %2080 = vmatpush.bf16.msra.mxu0 %v2949_v43  ;;  %v2930_v5 = vld [vmem:[#allocation6 + $0xd0] sm:$0xf0] }
 0x176   : > { %v4211_v52 = vpop.f32.mrf.mxu2  ;;  %v4214_v57 = vpop.f32.mrf.mxu0 }
 0x177   : > { %v917_v56 = vpop.f32.mrf.mxu3  ;;  %v742_v60 = vpop.f32.mrf.mxu1  ;;  %v829_v63 = vadd.f32 %v4211_v52, %v4079_v53  ;;  %v654_v48 = vadd.f32 %v4214_v57, %v4068_v42  ;;  %v1123_v52 = vadd.f32 %v1122_v39, %v1028_v58  ;;  %v1036_v57 = vmax.f32 %v740_v62, 0.0  ;;  %v3216_v39 = vld [vmem:[#allocation6 + $0x300] sm:$0xf]  ;;  %v3589_v62 = vld [vmem:[#allocation6 + $0x2e4] sm:$0xf] }
 0x178   : > { %v918_v46 = vadd.f32 %v917_v56, %v4082_v55  ;;  %v743_v49 = vadd.f32 %v742_v60, %v4071_v44  ;;  %v1032_v56 = vmax.f32 %v738_v59, 0.0 }
 0x179   : > { %v1037_v12 = vmax.f32 %v829_v63, 0.0  ;;  %v1039_v13 = vmax.f32 %v654_v48, 0.0  ;;  %v3202_v63 = vld [vmem:[#allocation6 + $0x2f0] sm:$0xf0] }
 0x17a   : > { %v1038_v60 = vmax.f32 %v918_v46, 0.0 }
 0x17b   : > { %v1162_v58 = vadd.f32 %v1161_v24, %v1037_v12  ;;  %v1089_v46 = vadd.f32 %v1088_v10, %v1039_v13  ;;  %v3553_v12 = vld [vmem:[#allocation6 + $0x1c4] sm:$0xf]  ;;  %v3314_v24 = vld [vmem:[#allocation6 + $0x3d0] sm:$0xf0] }
 0x17c   : > { %v4276_v20 = vadd.f32 %v1198_v25, %v1038_v60  ;;  %v3058_v60 = vld [vmem:[#allocation6 + $0x1d0] sm:$0xf0]  ;;  %v3585_v13 = vld [vmem:[#allocation6 + $0x2c4] sm:$0xf] }
 0x17d   : > { %v3061_v16 = vor.u32 %v3553_v12, %v3058_v60  ;;  %v3517_v25 = vld [vmem:[#allocation6 + $0xa4] sm:$0xf]  ;;  %v3154_v60 = vld [vmem:[#allocation6 + $0x290] sm:$0xf0] }
 0x17e   : > { %v831_v8 = vpop.f32.mrf.mxu2  ;;  %v655_v18 = vpop.f32.mrf.mxu0  ;;  %v3581_v10 = vld [vmem:[#allocation6 + $0x2a4] sm:$0xf] }
 0x17f   : > { %v4223_v17 = vpop.f32.mrf.mxu3  ;;  %v4226_v28 = vpop.f32.mrf.mxu1  ;;  %v4254_v1 = vadd.f32 %v831_v8, %v4079_v53  ;;  %v4257_v50 = vadd.f32 %v655_v18, %v4068_v42  ;;  %v1040_v8 = vmax.f32 %v743_v49, 0.0  ;;  %v1124_v18 = vadd.f32 %v1123_v52, %v1032_v56 }
 0x180   : > { %v4265_v26 = vadd.f32 %v4223_v17, %v4082_v55  ;;  %v4271_v33 = vadd.f32 %v4226_v28, %v4071_v44  ;;  %v3595_v17 = vld [vmem:[#allocation6 + $0x30c] sm:$0xf0]  ;;  %v3074_v28 = vld [vmem:[#allocation6 + $0x1f0] sm:$0xf0]  ;;  %v3205_v49 = vor.u32 %v3589_v62, %v3202_v63  ;;  %v343_v56 = vlaneseq  ;;  %v3513_v63 = vld [vmem:[#allocation6 + $0x84] sm:$0xf] }
 0x181   : > { %v1041_v14 = vmax.f32 %v4254_v1, 0.0  ;;  %v1043_v15 = vmax.f32 %v4257_v50, 0.0  ;;  %v1125_v54 = vadd.f32 %v1124_v18, %v1036_v57  ;;  %v3217_v59 = vor.u32 %v3595_v17, %v3216_v39  ;;  %v3621_v1 = vld [vmem:[#allocation6 + $0x3e4] sm:$0xf]  ;;  %v3330_v50 = vld [vmem:[#allocation6 + $0x3f0] sm:$0xf0] }
 0x182   : > { %v3077_v21 = vor.u32 %v3557_v61, %v3074_v28  ;;  %v1042_v48 = vmax.f32 %v4265_v26, 0.0  ;;  %v1044_v52 = vmax.f32 %v4271_v33, 0.0  ;;  %2106 = vmatpush.bf16.msra.mxu2 %v3205_v49  ;;  %v3333_v9 = vor.u32 %v3621_v1, %v3330_v50  ;;  %v3617_v18 = vld [vmem:[#allocation6 + $0x3c4] sm:$0xf]  ;;  %v2914_v33 = vld [vmem:[#allocation6 + $0xb0] sm:$0xf0] }
 0x183   : > { %2074 = vmatpush.bf16.msrb.mxu3 %v3217_v59  ;;  %v4281_v2 = vadd.f32 %v1162_v58, %v1041_v14  ;;  %v1090_v6 = vadd.f32 %v1089_v46, %v1043_v15  ;;  %v2933_v57 = vor.u32 %v3521_v4, %v2930_v5  ;;  %vm4293_vm3 = vcmp.lt.s32.totalorder %v343_v56, 512  ;;  %v3186_v15 = vld [vmem:[#allocation6 + $0x2d0] sm:$0xf0]  ;;  %v3545_v4 = vld [vmem:[#allocation6 + $0x184] sm:$0xf] }
 0x184   : > { %2093 = vmatpush.bf16.msra.mxu1 %v3077_v21  ;;  %347 = vst.msk [vmem:[#allocation2] sm:$0xf] %vm4293_vm3, %v3890_v23  ;;  %v3317_v32 = vor.u32 %v3617_v18, %v3314_v24  ;;  %v3298_v28 = vld [vmem:[#allocation6 + $0x3b0] sm:$0xf0]  ;;  %v1200_v46 = vadd.f32 %v4276_v20, %v1042_v48  ;;  %v3577_v20 = vld [vmem:[#allocation6 + $0x284] sm:$0xf] }
 0x185   : > { %2081 = vmatpush.bf16.msra.mxu0 %v2933_v57  ;;  %v2898_v56 = vld [vmem:[#allocation6 + $0x90] sm:$0xf0]  ;;  %v3509_v18 = vld [vmem:[#allocation6 + $0x64] sm:$0xf] }
 0x186   : > { %v4239_v45 = vpop.f32.mrf.mxu2  ;;  %v658_v0 = vpop.f32.mrf.mxu0  ;;  %v2901_v26 = vor.u32 %v3513_v63, %v2898_v56  ;;  %v3026_v57 = vld [vmem:[#allocation6 + $0x190] sm:$0xf0] }
 0x187   : > { %v4248_v47 = vpop.f32.mrf.mxu3  ;;  %v4259_v51 = vpop.f32.mrf.mxu1  ;;  %v4274_v34 = vadd.f32 %v658_v0, %v4068_v42  ;;  %v4278_v0 = vadd.f32 %v1125_v54, %v1040_v8  ;;  %v4287_v7 = vadd.f32 %v4239_v45, %v4079_v53  ;;  %2119 = vmatpush.bf16.msra.mxu3 %v3333_v9  ;;  %v3613_v54 = vld [vmem:[#allocation6 + $0x3a4] sm:$0xf]  ;;  %v3029_v12 = vor.u32 %v3545_v4, %v3026_v57 }
 0x188   : > { %v4291_v8 = vadd.f32 %v4248_v47, %v4082_v55  ;;  %v748_v45 = vadd.f32 %v4259_v51, %v4071_v44  ;;  %v3189_v47 = vor.u32 %v3585_v13, %v3186_v15  ;;  %2094 = vmatpush.bf16.msra.mxu1 %v3061_v16  ;;  %v3301_v62 = vor.u32 %v3613_v54, %v3298_v28  ;;  %v3609_v13 = vld [vmem:[#allocation6 + $0x384] sm:$0xf]  ;;  %v3282_v15 = vld [vmem:[#allocation6 + $0x390] sm:$0xf0] }
 0x189   : > { %v1047_v3 = vmax.f32 %v4274_v34, 0.0  ;;  %v1045_v58 = vmax.f32 %v4287_v7, 0.0  ;;  %v1127_v49 = vadd.f32 %v4278_v0, %v1044_v52  ;;  %v3157_v16 = vor.u32 %v3577_v20, %v3154_v60  ;;  %v3501_v57 = vld [vmem:[#allocation6 + $0x24] sm:$0xf] }
 0x18a   : > { %2107 = vmatpush.bf16.msra.mxu2 %v3189_v47  ;;  %v1048_v43 = vmax.f32 %v748_v45, 0.0  ;;  %v2882_v45 = vld [vmem:[#allocation6 + $0x70] sm:$0xf0]  ;;  %v3285_v47 = vor.u32 %v3609_v13, %v3282_v15 }
 0x18b   : > { %2120 = vmatpush.bf16.msra.mxu3 %v3317_v32  ;;  %v1091_v5 = vadd.f32 %v1090_v6, %v1047_v3  ;;  %v2885_v24 = vor.u32 %v3509_v18, %v2882_v45  ;;  %v3597_v18 = vld [vmem:[#allocation6 + $0x324] sm:$0xf]  ;;  %v3234_v45 = vld [vmem:[#allocation6 + $0x330] sm:$0xf0] }
 0x18c   : > { %v1128_v34 = vadd.f32 %v1127_v49, %v1048_v43  ;;  %v2994_v43 = vld [vmem:[#allocation6 + $0x150] sm:$0xf0]  ;;  %v3569_v49 = vld [vmem:[#allocation6 + $0x244] sm:$0xf] }
 0x18e   : > { %v4267_v27 = vpop.f32.mrf.mxu2  ;;  %v660_v37 = vpop.f32.mrf.mxu0 }
 0x18f   : > { %v925_v36 = vpop.f32.mrf.mxu3  ;;  %v749_v40 = vpop.f32.mrf.mxu1  ;;  %v661_v19 = vadd.f32 %v660_v37, %v4068_v42  ;;  %v4304_v29 = vadd.f32 %v4267_v27, %v4079_v53  ;;  %v3549_v37 = vld [vmem:[#allocation6 + $0x1a4] sm:$0xf]  ;;  %v2917_v27 = vor.u32 %v3517_v25, %v2914_v33  ;;  %2121 = vmatpush.bf16.msra.mxu3 %v3301_v62 }
 0x190   : > { %v4307_v30 = vadd.f32 %v925_v36, %v4082_v55  ;;  %v750_v38 = vadd.f32 %v749_v40, %v4071_v44  ;;  %v3045_v41 = vor.u32 %v3549_v37, %v3042_v35  ;;  %v3170_v36 = vld [vmem:[#allocation6 + $0x2b0] sm:$0xf0]  ;;  %v1046_v40 = vmax.f32 %v4291_v8, 0.0  ;;  %v3541_v25 = vld [vmem:[#allocation6 + $0x164] sm:$0xf] }
 0x191   : > { %v3173_v61 = vor.u32 %v3581_v10, %v3170_v36  ;;  %v1051_v21 = vmax.f32 %v661_v19, 0.0  ;;  %v1049_v1 = vmax.f32 %v4304_v29, 0.0  ;;  %2082 = vmatpush.bf16.msra.mxu0 %v2917_v27  ;;  %v1164_v8 = vadd.f32 %v4281_v2, %v1045_v58  ;;  %v3573_v2 = vld [vmem:[#allocation6 + $0x264] sm:$0xf]  ;;  %v3266_v27 = vld [vmem:[#allocation6 + $0x370] sm:$0xf0] }
 0x192   : > { %v1050_v50 = vmax.f32 %v4307_v30, 0.0  ;;  %2095 = vmatpush.bf16.msra.mxu1 %v3045_v41  ;;  %v1052_v7 = vmax.f32 %v750_v38, 0.0  ;;  %v3138_v38 = vld [vmem:[#allocation6 + $0x270] sm:$0xf0]  ;;  %v3505_v58 = vld [vmem:[#allocation6 + $0x44] sm:$0xf] }
 0x193   : > { %2108 = vmatpush.bf16.msra.mxu2 %v3173_v61  ;;  %v1092_v3 = vadd.f32 %v1091_v5, %v1051_v21  ;;  %v3141_v54 = vor.u32 %v3573_v2, %v3138_v38  ;;  %2122 = vmatpush.bf16.msra.mxu3 %v3285_v47  ;;  %v1165_v56 = vadd.f32 %v1164_v8, %v1049_v1  ;;  %v3565_v8 = vld [vmem:[#allocation6 + $0x224] sm:$0xf]  ;;  %v2834_v47 = vld [vmem:[#allocation6 + $0x10] sm:$0xf0] }
 0x194   : > { %v1129_v32 = vadd.f32 %v1128_v34, %v1052_v7  ;;  %v3601_v7 = vld [vmem:[#allocation6 + $0x344] sm:$0xf]  ;;  %v3090_v38 = vld [vmem:[#allocation6 + $0x210] sm:$0xf0] }
 0x195   : > { %2083 = vmatpush.bf16.msra.mxu0 %v2901_v26  ;;  %v3250_v26 = vld [vmem:[#allocation6 + $0x350] sm:$0xf0] }
 0x196   : > { %v838_v22 = vpop.f32.mrf.mxu2  ;;  %v663_v51 = vpop.f32.mrf.mxu0  ;;  %2096 = vmatpush.bf16.msra.mxu1 %v3029_v12  ;;  %v2978_v12 = vld [vmem:[#allocation6 + $0x130] sm:$0xf0]  ;;  %v3253_v1 = vor.u32 %v3601_v7, %v3250_v26 }
 0x197   : > { %v927_v31 = vpop.f32.mrf.mxu3  ;;  %v4311_v39 = vadd.f32 %v838_v22, %v4079_v53  ;;  %v752_v17 = vpop.f32.mrf.mxu1  ;;  %v664_v59 = vadd.f32 %v663_v51, %v4068_v42  ;;  %v1201_v51 = vadd.f32 %v1200_v46, %v1046_v40  ;;  %2109 = vmatpush.bf16.msra.mxu2 %v3157_v16  ;;  %v3537_v40 = vld [vmem:[#allocation6 + $0x144] sm:$0xf] }
 0x198   : > { %v4316_v11 = vadd.f32 %v752_v17, %v4071_v44  ;;  %v4329_v0 = vadd.f32 %v927_v31, %v4082_v55  ;;  %v3010_v31 = vld [vmem:[#allocation6 + $0x170] sm:$0xf0]  ;;  %v3605_v17 = vld [vmem:[#allocation6 + $0x364] sm:$0xf]  ;;  %v2997_v46 = vor.u32 %v3537_v40, %v2994_v43 }
 0x199   : > { %v1053_v9 = vmax.f32 %v4311_v39, 0.0  ;;  %v1055_v48 = vmax.f32 %v664_v59, 0.0  ;;  %v3013_v35 = vor.u32 %v3541_v25, %v3010_v31  ;;  %v2866_v59 = vld [vmem:[#allocation6 + $0x50] sm:$0xf0]  ;;  %2084 = vmatpush.bf16.msra.mxu0 %v2885_v24  ;;  %v1202_v20 = vadd.f32 %v1201_v51, %v1050_v50  ;;  %v3529_v24 = vld [vmem:[#allocation6 + $0x104] sm:$0xf] }
 0x19a   : > { %v1056_v52 = vmax.f32 %v4316_v11, 0.0  ;;  %v1054_v41 = vmax.f32 %v4329_v0, 0.0  ;;  %v2869_v63 = vor.u32 %v3505_v58, %v2866_v59  ;;  %v3561_v51 = vld [vmem:[#allocation6 + $0x204] sm:$0xf] }
 0x19b   : > { %v1093_v10 = vadd.f32 %v1092_v3, %v1055_v48  ;;  %2097 = vmatpush.bf16.msra.mxu1 %v3013_v35  ;;  %2110 = vmatpush.bf16.msra.mxu2 %v3141_v54  ;;  %v2850_v48 = vld [vmem:[#allocation6 + $0x30] sm:$0xf0]  ;;  %v1166_v60 = vadd.f32 %v1165_v56, %v1053_v9  ;;  %v3237_v35 = vor.u32 %v3597_v18, %v3234_v45 }
 0x19c   : > { %v1130_v11 = vadd.f32 %v1129_v32, %v1056_v52  ;;  %v3533_v52 = vld [vmem:[#allocation6 + $0x124] sm:$0xf]  ;;  %v3106_v3 = vld [vmem:[#allocation6 + $0x230] sm:$0xf0]  ;;  %v2853_v30 = vor.u32 %v3501_v57, %v2850_v48  ;;  %v3093_v59 = vor.u32 %v3561_v51, %v3090_v38  ;;  %v3320_v38 = vld [vmem:[#allocation6 + $0x3c8] sm:$0xf] }
 0x19d   : > { %2085 = vmatpush.bf16.msra.mxu0 %v2869_v63  ;;  %v2981_v50 = vor.u32 %v3533_v52, %v2978_v12  ;;  %v1063_v12 = vld [vmem:[#allocation2] sm:$0xf] }
 0x19e   : > { %v841_v6 = vpop.f32.mrf.mxu2  ;;  %v665_v23 = vpop.f32.mrf.mxu0 }
 0x19f   : > { %v4334_v19 = vadd.f32 %v841_v6, %v4079_v53  ;;  %v930_v22 = vpop.f32.mrf.mxu3  ;;  %v666_v33 = vadd.f32 %v665_v23, %v4068_v42  ;;  %v754_v37 = vpop.f32.mrf.mxu1  ;;  %v3269_v42 = vor.u32 %v3605_v17, %v3266_v27  ;;  %2098 = vmatpush.bf16.msra.mxu1 %v2997_v46  ;;  %v3497_v23 = vld [vmem:[#allocation6 + $0x4] sm:$0xf] }
 0x1a0   : > { %v755_v36 = vadd.f32 %v754_v37, %v4071_v44  ;;  %v931_v61 = vadd.f32 %v930_v22, %v4082_v55  ;;  %v3122_v44 = vld [vmem:[#allocation6 + $0x250] sm:$0xf0]  ;;  %v3109_v22 = vor.u32 %v3565_v8, %v3106_v3  ;;  %v3528_v8 = vld [vmem:[#allocation6 + $0xf4] sm:$0xf0] }
 0x1a1   : > { %v1059_v28 = vmax.f32 %v666_v33, 0.0  ;;  %v1057_v21 = vmax.f32 %v4334_v19, 0.0  ;;  %v3125_v5 = vor.u32 %v3569_v49, %v3122_v44  ;;  %2123 = vmatpush.bf16.msra.mxu3 %v3269_v42  ;;  %v1203_v19 = vadd.f32 %v1202_v20, %v1054_v41  ;;  %2086 = vmatpush.bf16.msra.mxu0 %v2853_v30  ;;  %v3592_v30 = vld [vmem:[#allocation6 + $0x2f4] sm:$0xf0] }
 0x1a2   : > { %v1060_v62 = vmax.f32 %v755_v36, 0.0  ;;  %v1058_v13 = vmax.f32 %v931_v61, 0.0  ;;  %v3218_v36 = vld [vmem:[#allocation6 + $0x310] sm:$0xf0] }
 0x1a3   : > { %v1094_v4 = vadd.f32 %v1093_v10, %v1059_v28  ;;  %2111 = vmatpush.bf16.msra.mxu2 %v3125_v5  ;;  %v1167_v25 = vadd.f32 %v1166_v60, %v1057_v21  ;;  %2099 = vmatpush.bf16.msra.mxu1 %v2981_v50  ;;  %v3593_v10 = vld [vmem:[#allocation6 + $0x304] sm:$0xf]  ;;  %v3336_v50 = vld [vmem:[#allocation6 + $0x3e8] sm:$0xf] }
 0x1a4   : > { %v1131_v0 = vadd.f32 %v1130_v11, %v1060_v62  ;;  %v1204_v32 = vadd.f32 %v1203_v19, %v1058_v13  ;;  %v3221_v42 = vor.u32 %v3593_v10, %v3218_v36  ;;  %v3520_v10 = vld [vmem:[#allocation6 + $0xb4] sm:$0xf0] }
 0x1a5   : > { %v1095_v34 = vrot.slane %v1094_v4, 4  ;;  %2124 = vmatpush.bf16.msra.mxu3 %v3253_v1  ;;  %v2952_v1 = vld [vmem:[#allocation6 + $0xe8] sm:$0xf] }
 0x1a6   : > { %v843_v29 = vpop.f32.mrf.mxu2  ;;  %v1132_v6 = vrot.slane %v1131_v0, 4 }
 0x1a7   : > { %v844_v16 = vadd.f32 %v843_v29, %v4079_v53  ;;  %v932_v15 = vpop.f32.mrf.mxu3  ;;  %v1096_v39 = vadd.f32 %v1095_v34, %v1094_v4  ;;  %v2962_v53 = vld [vmem:[#allocation6 + $0x110] sm:$0xf0]  ;;  %2112 = vmatpush.bf16.msra.mxu2 %v3109_v22  ;;  %v2953_v22 = vor.u32 %v3528_v8, %v2952_v1  ;;  %v3608_v1 = vld [vmem:[#allocation6 + $0x374] sm:$0xf0] }
 0x1a8   : > { %v933_v9 = vadd.f32 %v932_v15, %v4082_v55  ;;  %v1133_v31 = vadd.f32 %v1132_v6, %v1131_v0  ;;  %v2837_v55 = vor.u32 %v3497_v23, %v2834_v47  ;;  %v2965_v41 = vor.u32 %v3529_v24, %v2962_v53  ;;  %v3080_v6 = vld [vmem:[#allocation6 + $0x1e8] sm:$0xf] }
 0x1a9   : > { %v1061_v2 = vmax.f32 %v844_v16, 0.0  ;;  %v1097_v33 = vrot.slane %v1096_v39, 2  ;;  %2125 = vmatpush.bf16.msra.mxu3 %v3237_v35  ;;  %v3560_v16 = vld [vmem:[#allocation6 + $0x1f4] sm:$0xf0]  ;;  %v3208_v15 = vld [vmem:[#allocation6 + $0x2e8] sm:$0xf] }
 0x1aa   : > { %v1062_v37 = vmax.f32 %v933_v9, 0.0  ;;  %v1134_v17 = vrot.slane %v1133_v31, 2  ;;  %2087 = vmatpush.bf16.msra.mxu0 %v2837_v55  ;;  %2100 = vmatpush.bf16.msra.mxu1 %v2965_v41  ;;  %v3624_v9 = vld [vmem:[#allocation6 + $0x3f4] sm:$0xf0]  ;;  %v3081_v23 = vor.u32 %v3560_v16, %v3080_v6  ;;  %v3209_v53 = vor.u32 %v3592_v30, %v3208_v15  ;;  %v2920_v41 = vld [vmem:[#allocation6 + $0xa8] sm:$0xf] }
 0x1ab   : > { %v1168_v27 = vadd.f32 %v1167_v25, %v1061_v2  ;;  %v1098_v54 = vadd.f32 %v1097_v33, %v1096_v39  ;;  %2113 = vmatpush.bf16.msra.mxu2 %v3093_v59  ;;  %v3524_v2 = vld [vmem:[#allocation6 + $0xd4] sm:$0xf0]  ;;  %v3337_v51 = vor.u32 %v3624_v9, %v3336_v50  ;;  %v2872_v6 = vld [vmem:[#allocation6 + $0x48] sm:$0xf] }
 0x1ac   : > { %v1205_v58 = vadd.f32 %v1204_v32, %v1062_v37  ;;  %v1135_v11 = vadd.f32 %v1134_v17, %v1133_v31  ;;  %v2936_v31 = vld [vmem:[#allocation6 + $0xc8] sm:$0xf]  ;;  %v3556_v33 = vld [vmem:[#allocation6 + $0x1d4] sm:$0xf0] }
 0x1ad   : > { %v1169_v61 = vrot.slane %v1168_v27, 4  ;;  %v1099_v40 = vrot.slane %v1098_v54, 1  ;;  %2126 = vmatpush.bf16.msra.mxu3 %v3221_v42  ;;  %v3064_v32 = vld [vmem:[#allocation6 + $0x1c8] sm:$0xf]  ;;  %v3588_v35 = vld [vmem:[#allocation6 + $0x2d4] sm:$0xf0] }
 0x1ae   : > { %v1206_v28 = vrot.slane %v1205_v58, 4  ;;  %v1136_v43 = vrot.slane %v1135_v11, 1  ;;  %v3192_v37 = vld [vmem:[#allocation6 + $0x2c8] sm:$0xf]  ;;  %v3620_v17 = vld [vmem:[#allocation6 + $0x3d4] sm:$0xf0]  ;;  %v3065_v55 = vor.u32 %v3556_v33, %v3064_v32 }
 0x1af   : > { %v1170_v21 = vadd.f32 %v1169_v61, %v1168_v27  ;;  %v1100_v44 = vadd.f32 %v1099_v40, %v1098_v54  ;;  %v2937_v27 = vor.u32 %v3524_v2, %v2936_v31  ;;  %v3193_v36 = vor.u32 %v3588_v35, %v3192_v37  ;;  %v3552_v59 = vld [vmem:[#allocation6 + $0x1b4] sm:$0xf0]  ;;  %v3000_v50 = vld [vmem:[#allocation6 + $0x148] sm:$0xf] }
 0x1b0   : > { %v1207_v62 = vadd.f32 %v1206_v28, %v1205_v58  ;;  %v1137_v63 = vadd.f32 %v1136_v43, %v1135_v11  ;;  %v3321_v54 = vor.u32 %v3620_v17, %v3320_v38  ;;  %v3048_v58 = vld [vmem:[#allocation6 + $0x1a8] sm:$0xf]  ;;  %v3584_v61 = vld [vmem:[#allocation6 + $0x2b4] sm:$0xf0]  ;;  %v2921_v40 = vor.u32 %v3520_v10, %v2920_v41 }
 0x1b1   : > { %v1171_v46 = vrot.slane %v1170_v21, 2  ;;  %v3176_v11 = vld [vmem:[#allocation6 + $0x2a8] sm:$0xf]  ;;  %v3616_v42 = vld [vmem:[#allocation6 + $0x3b4] sm:$0xf0]  ;;  %v3049_v43 = vor.u32 %v3552_v59, %v3048_v58 }
 0x1b2   : > { %v1208_v49 = vrot.slane %v1207_v62, 2  ;;  %v1216_v56 = vrot.slane %v1137_v63, 7  ;;  %v3304_v28 = vld [vmem:[#allocation6 + $0x3a8] sm:$0xf]  ;;  %v3177_v63 = vor.u32 %v3584_v61, %v3176_v11  ;;  %v3508_v16 = vld [vmem:[#allocation6 + $0x54] sm:$0xf0] }
 0x1b3   : > { %v1172_v4 = vadd.f32 %v1171_v46, %v1170_v21  ;;  %v2904_v21 = vld [vmem:[#allocation6 + $0x88] sm:$0xf]  ;;  %v3305_v46 = vor.u32 %v3616_v42, %v3304_v28  ;;  %v3604_v9 = vld [vmem:[#allocation6 + $0x354] sm:$0xf0] }
 0x1b4   : > { %v1209_v5 = vadd.f32 %v1208_v49, %v1207_v62  ;;  %v1220_v7 = vsel %vm1219_vm4, %v1100_v44, %v1216_v56  ;;  %v3516_v62 = vld [vmem:[#allocation6 + $0x94] sm:$0xf0]  ;;  %v3032_v49 = vld [vmem:[#allocation6 + $0x188] sm:$0xf] }
 0x1b5   : > { %v1173_v26 = vrot.slane %v1172_v4, 1  ;;  %v3548_v44 = vld [vmem:[#allocation6 + $0x194] sm:$0xf0]  ;;  %v3160_v56 = vld [vmem:[#allocation6 + $0x288] sm:$0xf] }
 0x1b6   : > { %v1210_v57 = vrot.slane %v1209_v5, 1  ;;  %v2856_v31 = vld [vmem:[#allocation6 + $0x28] sm:$0xf]  ;;  %v3504_v2 = vld [vmem:[#allocation6 + $0x34] sm:$0xf0] }
 0x1b7   : > { %v1174_v20 = vadd.f32 %v1173_v26, %v1172_v4  ;;  %v3580_v4 = vld [vmem:[#allocation6 + $0x294] sm:$0xf0]  ;;  %v2905_v26 = vor.u32 %v3516_v62, %v2904_v21  ;;  %v2984_v32 = vld [vmem:[#allocation6 + $0x128] sm:$0xf]  ;;  %v3558_v21 = vld [vmem:[#allocation6 + $0x1ec] sm:$0xf] }
 0x1b8   : > { %v1211_v0 = vadd.f32 %v1210_v57, %v1209_v5  ;;  %v3288_v5 = vld [vmem:[#allocation6 + $0x388] sm:$0xf]  ;;  %v3033_v57 = vor.u32 %v3548_v44, %v3032_v49  ;;  %v3536_v33 = vld [vmem:[#allocation6 + $0x134] sm:$0xf0]  ;;  %v3082_v62 = vld [vmem:[#allocation6 + $0x1f8] sm:$0xf0] }
 0x1b9   : > { %v1217_v48 = vrot.slane %v1174_v20, 6  ;;  %v2888_v20 = vld [vmem:[#allocation6 + $0x68] sm:$0xf]  ;;  %v3568_v35 = vld [vmem:[#allocation6 + $0x234] sm:$0xf0]  ;;  %v2985_v41 = vor.u32 %v3536_v33, %v2984_v32 }
 0x1ba   : > { %v1218_v52 = vrot.slane %v1211_v0, 5  ;;  %v3512_v0 = vld [vmem:[#allocation6 + $0x74] sm:$0xf0]  ;;  %v3112_v37 = vld [vmem:[#allocation6 + $0x228] sm:$0xf] }
 0x1bb   : > { %v2889_v8 = vor.u32 %v3512_v0, %v2888_v20  ;;  %v3240_v38 = vld [vmem:[#allocation6 + $0x328] sm:$0xf]  ;;  %v3600_v17 = vld [vmem:[#allocation6 + $0x334] sm:$0xf0]  ;;  %v3113_v58 = vor.u32 %v3568_v35, %v3112_v37  ;;  %v3210_v44 = vld [vmem:[#allocation6 + $0x2f8] sm:$0xf0] }
 0x1bc   : > { %v1222_v60 = vsel %vm1221_vm5, %v1217_v48, %v1218_v52  ;;  %v3161_v48 = vor.u32 %v3580_v4, %v3160_v56  ;;  %v3500_v10 = vld [vmem:[#allocation6 + $0x14] sm:$0xf0]  ;;  %v3241_v59 = vor.u32 %v3600_v17, %v3240_v38  ;;  %v3096_v11 = vld [vmem:[#allocation6 + $0x208] sm:$0xf]  ;;  %v3622_v56 = vld [vmem:[#allocation6 + $0x3ec] sm:$0xf] }
 0x1bd   : > { %v1224_v13 = vsel %vm1223_vm6, %v1220_v7, %v1222_v60  ;;  %v3612_v7 = vld [vmem:[#allocation6 + $0x394] sm:$0xf0]  ;;  %v3224_v28 = vld [vmem:[#allocation6 + $0x308] sm:$0xf]  ;;  %v3338_v4 = vld [vmem:[#allocation6 + $0x3f8] sm:$0xf0] }
 0x1be   : > { %v1226_v34 = vadd.f32 %v1224_v13, %v1063_v12  ;;  %v3289_v52 = vor.u32 %v3612_v7, %v3288_v5  ;;  %v3016_v12 = vld [vmem:[#allocation6 + $0x168] sm:$0xf]  ;;  %v3544_v60 = vld [vmem:[#allocation6 + $0x174] sm:$0xf0]  ;;  %v3522_v20 = vld [vmem:[#allocation6 + $0xcc] sm:$0xf] }
 0x1bf   : > { %v3144_v13 = vld [vmem:[#allocation6 + $0x268] sm:$0xf]  ;;  %v3564_v61 = vld [vmem:[#allocation6 + $0x214] sm:$0xf0]  ;;  %v2938_v0 = vld [vmem:[#allocation6 + $0xd8] sm:$0xf0] }
 0x1c0   : > { %1231 = vst.msk [vmem:[#allocation2] sm:$0xf] %vm4293_vm3, %v1226_v34  ;;  %v3576_v34 = vld [vmem:[#allocation6 + $0x274] sm:$0xf0]  ;;  %v3097_v5 = vor.u32 %v3564_v61, %v3096_v11  ;;  %v3546_v32 = vld [vmem:[#allocation6 + $0x18c] sm:$0xf] }
 0x1c1   : > { %v3145_v15 = vor.u32 %v3576_v34, %v3144_v13  ;;  %v3596_v42 = vld [vmem:[#allocation6 + $0x314] sm:$0xf0]  ;;  %v3586_v13 = vld [vmem:[#allocation6 + $0x2cc] sm:$0xf]  ;;  %v3194_v34 = vld [vmem:[#allocation6 + $0x2d8] sm:$0xf0] }
 0x1c2   : > { %v3225_v7 = vor.u32 %v3596_v42, %v3224_v28  ;;  %v3034_v33 = vld [vmem:[#allocation6 + $0x198] sm:$0xf0]  ;;  %v3578_v37 = vld [vmem:[#allocation6 + $0x28c] sm:$0xf] }
 0x1c3   : > { %v3162_v35 = vld [vmem:[#allocation6 + $0x298] sm:$0xf0]  ;;  %v3610_v38 = vld [vmem:[#allocation6 + $0x38c] sm:$0xf] }
 0x1c4   : > { %v3290_v17 = vld [vmem:[#allocation6 + $0x398] sm:$0xf0]  ;;  %v3574_v11 = vld [vmem:[#allocation6 + $0x26c] sm:$0xf] }
 0x1c5   : > { %v3146_v61 = vld [vmem:[#allocation6 + $0x278] sm:$0xf0]  ;;  %v3606_v28 = vld [vmem:[#allocation6 + $0x36c] sm:$0xf] }
 0x1c6   : > { %v3274_v42 = vld [vmem:[#allocation6 + $0x378] sm:$0xf0] }
 0x1c7   : > { %v1235_v29 = vld [vmem:[#allocation2] sm:$0xf] }
 0x1c8   : > { %v1236_v3 = vmul.f32 0.00390625, %v1235_v29  ;;  %v3272_v29 = vld [vmem:[#allocation6 + $0x368] sm:$0xf] }
 0x1c9   : > { %v3273_v30 = vor.u32 %v3608_v1, %v3272_v29  ;;  %v3618_v29 = vld [vmem:[#allocation6 + $0x3cc] sm:$0xf]  ;;  %v3322_v1 = vld [vmem:[#allocation6 + $0x3d8] sm:$0xf0] }
 0x1ca   : > { %v1238_v18 = vperm.slane %v1236_v3, 0  ;;  %v1239_v45 = vperm.slane %v1236_v3, 1  ;;  %v1240_v19 = vperm.slane %v1236_v3, 2  ;;  %v1241_v39 = vperm.slane %v1236_v3, 3 }
 0x1cb   : > { %v3017_v3 = vor.u32 %v3544_v60, %v3016_v12  ;;  %v3554_v12 = vld [vmem:[#allocation6 + $0x1cc] sm:$0xf]  ;;  %v3066_v60 = vld [vmem:[#allocation6 + $0x1d8] sm:$0xf0] }
 0x1cc   : > { %v4351_v47 = vpack.c.bf16 %v1238_v18, %v1238_v18  ;;  %v4353_v14 = vpack.c.bf16 %v1239_v45, %v1239_v45  ;;  %v4355_v24 = vpack.c.bf16 %v1240_v19, %v1240_v19  ;;  %v4357_v25 = vpack.c.bf16 %v1241_v39, %v1241_v39  ;;  %v3540_v18 = vld [vmem:[#allocation6 + $0x154] sm:$0xf0]  ;;  %v3128_v45 = vld [vmem:[#allocation6 + $0x248] sm:$0xf] }
 0x1cd   : > { %v3572_v19 = vld [vmem:[#allocation6 + $0x254] sm:$0xf0]  ;;  %v3256_v39 = vld [vmem:[#allocation6 + $0x348] sm:$0xf] }
 0x1ce   : > { %2036 = vmatmul.bf16.vlgmr.msrb.gmra.mxu0 %v4351_v47  ;;  %2049 = vmatmul.bf16.vlgmr.msrb.gmra.mxu1 %v4353_v14 }
 0x1cf   : > { %2062 = vmatmul.bf16.vlgmr.msrb.gmra.mxu2 %v4355_v24  ;;  %2075 = vmatmul.bf16.vlgmr.msrb.gmra.mxu3 %v4357_v25 }
 0x1d0   : > { %2132 = vmatpush.bf16.msrb.mxu0 %v2953_v22  ;;  %2145 = vmatpush.bf16.msrb.mxu1 %v3081_v23  ;;  %v2873_v22 = vor.u32 %v3508_v16, %v2872_v6  ;;  %v3001_v23 = vor.u32 %v3540_v18, %v3000_v50  ;;  %v3518_v6 = vld [vmem:[#allocation6 + $0xac] sm:$0xf]  ;;  %v2922_v16 = vld [vmem:[#allocation6 + $0xb8] sm:$0xf0] }
 0x1d1   : > { %2158 = vmatpush.bf16.msrb.mxu2 %v3209_v53  ;;  %2171 = vmatpush.bf16.msrb.mxu3 %v3337_v51  ;;  %v3129_v53 = vor.u32 %v3572_v19, %v3128_v45  ;;  %v3257_v51 = vor.u32 %v3604_v9, %v3256_v39  ;;  %v3550_v50 = vld [vmem:[#allocation6 + $0x1ac] sm:$0xf]  ;;  %v3050_v18 = vld [vmem:[#allocation6 + $0x1b8] sm:$0xf0] }
 0x1d2   : > { %v3582_v45 = vld [vmem:[#allocation6 + $0x2ac] sm:$0xf]  ;;  %v3178_v19 = vld [vmem:[#allocation6 + $0x2b8] sm:$0xf0] }
 0x1d3   : > { %v3614_v39 = vld [vmem:[#allocation6 + $0x3ac] sm:$0xf]  ;;  %v3306_v9 = vld [vmem:[#allocation6 + $0x3b8] sm:$0xf0] }
 0x1d4   : > { %2133 = vmatpush.bf16.msrb.mxu0 %v2937_v27  ;;  %2146 = vmatpush.bf16.msrb.mxu1 %v3065_v55  ;;  %v2840_v27 = vld [vmem:[#allocation6 + $0x8] sm:$0xf]  ;;  %v2857_v55 = vor.u32 %v3504_v2, %v2856_v31  ;;  %v3514_v31 = vld [vmem:[#allocation6 + $0x8c] sm:$0xf]  ;;  %v2906_v2 = vld [vmem:[#allocation6 + $0x98] sm:$0xf0] }
 0x1d5   : > { %2159 = vmatpush.bf16.msrb.mxu2 %v3193_v36  ;;  %2172 = vmatpush.bf16.msrb.mxu3 %v3321_v54  ;;  %v2968_v36 = vld [vmem:[#allocation6 + $0x108] sm:$0xf]  ;;  %v3532_v54 = vld [vmem:[#allocation6 + $0x114] sm:$0xf0] }
 0x1d6   : > { %v2969_v49 = vor.u32 %v3532_v54, %v2968_v36  ;;  %v3165_v36 = vor.u32 %v3578_v37, %v3162_v35  ;;  %v3293_v54 = vor.u32 %v3610_v38, %v3290_v17  ;;  %v3626_v37 = vld [vmem:[%s4525_s5 + $0x8] sm:$0xff]  ;;  %v3625_v38 = vld [vmem:[%s4525_s5] sm:$0xff] }
 0x1d7   : > { %v3638_v35 = vld [vmem:[%s4525_s5 + $0x68] sm:$0xff]  ;;  %v3637_v17 = vld [vmem:[%s4525_s5 + $0x60] sm:$0xff] }
 0x1d8   : > { %2134 = vmatpush.bf16.msrb.mxu0 %v2921_v40  ;;  %2147 = vmatpush.bf16.msrb.mxu1 %v3049_v43  ;;  %v3526_v40 = vld [vmem:[#allocation6 + $0xec] sm:$0xf]  ;;  %v2954_v43 = vld [vmem:[#allocation6 + $0xf8] sm:$0xf0] }
 0x1d9   : > { %2160 = vmatpush.bf16.msrb.mxu2 %v3177_v63  ;;  %2173 = vmatpush.bf16.msrb.mxu3 %v3305_v46  ;;  %v3590_v63 = vld [vmem:[#allocation6 + $0x2ec] sm:$0xf]  ;;  %v2841_v46 = vor.u32 %v3500_v10, %v2840_v27  ;;  %v2909_v27 = vor.u32 %v3514_v31, %v2906_v2  ;;  %v2890_v10 = vld [vmem:[#allocation6 + $0x78] sm:$0xf0] }
 0x1dc   : > { %2135 = vmatpush.bf16.msrb.mxu0 %v2905_v26  ;;  %2148 = vmatpush.bf16.msrb.mxu1 %v3033_v57  ;;  %v2957_v26 = vor.u32 %v3526_v40, %v2954_v43  ;;  %v3085_v57 = vor.u32 %v3558_v21, %v3082_v62  ;;  %v3506_v21 = vld [vmem:[#allocation6 + $0x4c] sm:$0xf]  ;;  %v2874_v62 = vld [vmem:[#allocation6 + $0x58] sm:$0xf0] }
 0x1dd   : > { %2161 = vmatpush.bf16.msrb.mxu2 %v3161_v48  ;;  %2174 = vmatpush.bf16.msrb.mxu3 %v3289_v52  ;;  %v3213_v48 = vor.u32 %v3590_v63, %v3210_v44  ;;  %v3341_v52 = vor.u32 %v3622_v56, %v3338_v4  ;;  %v3149_v63 = vor.u32 %v3574_v11, %v3146_v61  ;;  %v3002_v44 = vld [vmem:[#allocation6 + $0x158] sm:$0xf0]  ;;  %v3570_v56 = vld [vmem:[#allocation6 + $0x24c] sm:$0xf] }
 0x1de   : > { %2088 = vmatmul.bf16.vlgmr.msra.gmra.mxu0 %v4351_v47  ;;  %2101 = vmatmul.bf16.vlgmr.msra.gmra.mxu1 %v4353_v14  ;;  %v3130_v4 = vld [vmem:[#allocation6 + $0x258] sm:$0xf0] }
 0x1df   : > { %2114 = vmatmul.bf16.vlgmr.msra.gmra.mxu2 %v4355_v24  ;;  %2127 = vmatmul.bf16.vlgmr.msra.gmra.mxu3 %v4357_v25  ;;  %v3633_v11 = vld [vmem:[%s4525_s5 + $0x40] sm:$0xff] }
 0x1e0   : > { %2136 = vmatpush.bf16.msrb.mxu0 %v2889_v8  ;;  %2149 = vmatpush.bf16.msrb.mxu1 %v3017_v3  ;;  %v2941_v8 = vor.u32 %v3522_v20, %v2938_v0  ;;  %v3069_v3 = vor.u32 %v3554_v12, %v3066_v60  ;;  %v3502_v20 = vld [vmem:[#allocation6 + $0x2c] sm:$0xf]  ;;  %v2858_v0 = vld [vmem:[#allocation6 + $0x38] sm:$0xf0] }
 0x1e1   : > { %2162 = vmatpush.bf16.msrb.mxu2 %v3145_v15  ;;  %2175 = vmatpush.bf16.msrb.mxu3 %v3273_v30  ;;  %v3197_v15 = vor.u32 %v3586_v13, %v3194_v34  ;;  %v3325_v30 = vor.u32 %v3618_v29, %v3322_v1  ;;  %v3534_v12 = vld [vmem:[#allocation6 + $0x12c] sm:$0xf]  ;;  %v2986_v60 = vld [vmem:[#allocation6 + $0x138] sm:$0xf0] }
 0x1e2   : > { %v3566_v13 = vld [vmem:[#allocation6 + $0x22c] sm:$0xf]  ;;  %v3114_v34 = vld [vmem:[#allocation6 + $0x238] sm:$0xf0] }
 0x1e3   : > { %v3598_v29 = vld [vmem:[#allocation6 + $0x32c] sm:$0xf]  ;;  %v3242_v1 = vld [vmem:[#allocation6 + $0x338] sm:$0xf0] }
 0x1e4   : > { %2137 = vmatpush.bf16.msrb.mxu0 %v2873_v22  ;;  %2150 = vmatpush.bf16.msrb.mxu1 %v3001_v23  ;;  %v2925_v22 = vor.u32 %v3518_v6, %v2922_v16  ;;  %v3053_v23 = vor.u32 %v3550_v50, %v3050_v18  ;;  %v3498_v6 = vld [vmem:[#allocation6 + $0xc] sm:$0xf]  ;;  %v2842_v16 = vld [vmem:[#allocation6 + $0x18] sm:$0xf0] }
 0x1e5   : > { %2163 = vmatpush.bf16.msrb.mxu2 %v3129_v53  ;;  %2176 = vmatpush.bf16.msrb.mxu3 %v3257_v51  ;;  %v3181_v53 = vor.u32 %v3582_v45, %v3178_v19  ;;  %v3309_v51 = vor.u32 %v3614_v39, %v3306_v9  ;;  %v3530_v50 = vld [vmem:[#allocation6 + $0x10c] sm:$0xf]  ;;  %v2970_v18 = vld [vmem:[#allocation6 + $0x118] sm:$0xf0] }
 0x1e6   : > { %v3562_v45 = vld [vmem:[#allocation6 + $0x20c] sm:$0xf]  ;;  %v3098_v19 = vld [vmem:[#allocation6 + $0x218] sm:$0xf0] }
 0x1e7   : > { %v3594_v39 = vld [vmem:[#allocation6 + $0x30c] sm:$0xf]  ;;  %v3226_v9 = vld [vmem:[#allocation6 + $0x318] sm:$0xf0]  ;;  %v3101_v31 = vor.u32 %v3562_v45, %v3098_v19  ;;  %v3652_v19 = vld [vmem:[%s4525_s5 + $0xd8] sm:$0xff] }
 0x1e8   : > { %2138 = vmatpush.bf16.msrb.mxu0 %v2857_v55  ;;  %2151 = vmatpush.bf16.msrb.mxu1 %v2985_v41  ;;  %v3037_v55 = vor.u32 %v3546_v32, %v3034_v33  ;;  %v3510_v41 = vld [vmem:[#allocation6 + $0x6c] sm:$0xf]  ;;  %v3229_v2 = vor.u32 %v3594_v39, %v3226_v9  ;;  %v3630_v32 = vld [vmem:[%s4525_s5 + $0x28] sm:$0xff]  ;;  %v3629_v33 = vld [vmem:[%s4525_s5 + $0x20] sm:$0xff] }
 0x1e9   : > { %2164 = vmatpush.bf16.msrb.mxu2 %v3113_v58  ;;  %2177 = vmatpush.bf16.msrb.mxu3 %v3241_v59  ;;  %v3542_v58 = vld [vmem:[#allocation6 + $0x16c] sm:$0xf]  ;;  %v3018_v59 = vld [vmem:[#allocation6 + $0x178] sm:$0xf0]  ;;  %v2893_v40 = vor.u32 %v3510_v41, %v2890_v10 }
 0x1ea   : > { %v3021_v43 = vor.u32 %v3542_v58, %v3018_v59  ;;  %v3635_v41 = vld [vmem:[%s4525_s5 + $0x50] sm:$0xff]  ;;  %v4432_v58 = vld [vmem:[%s4524_s4] sm:$0xf] }
 0x1eb   : > { %v3647_v10 = vld [vmem:[%s4525_s5 + $0xb0] sm:$0xff]  ;;  %v2020_v59 = vperm.slane %v4432_v58, 0  ;;  %v3645_v61 = vld [vmem:[%s4525_s5 + $0xa0] sm:$0xff] }
 0x1ec   : > { %2139 = vmatpush.bf16.msrb.mxu0 %v2841_v46  ;;  %2152 = vmatpush.bf16.msrb.mxu1 %v2969_v49  ;;  %v3277_v46 = vor.u32 %v3606_v28, %v3274_v42  ;;  %v3538_v49 = vld [vmem:[#allocation6 + $0x14c] sm:$0xf] }
 0x1ed   : > { %2165 = vmatpush.bf16.msrb.mxu2 %v3097_v5  ;;  %2178 = vmatpush.bf16.msrb.mxu3 %v3225_v7  ;;  %v3602_v5 = vld [vmem:[#allocation6 + $0x34c] sm:$0xf]  ;;  %v3258_v7 = vld [vmem:[#allocation6 + $0x358] sm:$0xf0] }
 0x1ef   : > { %2140 = vmatmul.bf16.vlgmr.msrb.gmra.mxu0 %v4351_v47  ;;  %2153 = vmatmul.bf16.vlgmr.msrb.gmra.mxu1 %v4353_v14 }
 0x1f0   : > { %2184 = vmatpush.bf16.msra.mxu0 %v2957_v26  ;;  %2197 = vmatpush.bf16.msra.mxu1 %v3085_v57  ;;  %v2877_v26 = vor.u32 %v3506_v21, %v2874_v62  ;;  %v3005_v57 = vor.u32 %v3538_v49, %v3002_v44  ;;  %v3643_v21 = vld [vmem:[%s4525_s5 + $0x90] sm:$0xff] }
 0x1f1   : > { %2210 = vmatpush.bf16.msra.mxu2 %v3213_v48  ;;  %2223 = vmatpush.bf16.msra.mxu3 %v3341_v52  ;;  %v3133_v48 = vor.u32 %v3570_v56, %v3130_v4  ;;  %v3261_v52 = vor.u32 %v3602_v5, %v3258_v7  ;;  %v3642_v5 = vld [vmem:[%s4525_s5 + $0x88] sm:$0xff] }
 0x1f2   : > { %2166 = vmatmul.bf16.vlgmr.msrb.gmra.mxu2 %v4355_v24  ;;  %2179 = vmatmul.bf16.vlgmr.msrb.gmra.mxu3 %v4357_v25 }
 0x1f4   : > { %2185 = vmatpush.bf16.msra.mxu0 %v2941_v8  ;;  %2198 = vmatpush.bf16.msra.mxu1 %v3069_v3  ;;  %v2861_v8 = vor.u32 %v3502_v20, %v2858_v0  ;;  %v2989_v3 = vor.u32 %v3534_v12, %v2986_v60  ;;  %v3641_v20 = vld [vmem:[%s4525_s5 + $0x80] sm:$0xff]  ;;  %v3656_v0 = vld [vmem:[%s4525_s5 + $0xf8] sm:$0xff] }
 0x1f5   : > { %2211 = vmatpush.bf16.msra.mxu2 %v3197_v15  ;;  %2224 = vmatpush.bf16.msra.mxu3 %v3325_v30  ;;  %v3117_v15 = vor.u32 %v3566_v13, %v3114_v34  ;;  %v3245_v30 = vor.u32 %v3598_v29, %v3242_v1  ;;  %v3655_v34 = vld [vmem:[%s4525_s5 + $0xf0] sm:$0xff]  ;;  %v3654_v29 = vld [vmem:[%s4525_s5 + $0xe8] sm:$0xff] }
 0x1f8   : > { %2186 = vmatpush.bf16.msra.mxu0 %v2925_v22  ;;  %2199 = vmatpush.bf16.msra.mxu1 %v3053_v23  ;;  %v2845_v22 = vor.u32 %v3498_v6, %v2842_v16  ;;  %v2973_v23 = vor.u32 %v3530_v50, %v2970_v18 }
 0x1f9   : > { %2212 = vmatpush.bf16.msra.mxu2 %v3181_v53  ;;  %2225 = vmatpush.bf16.msra.mxu3 %v3309_v51  ;;  %v3632_v53 = vld [vmem:[%s4525_s5 + $0x38] sm:$0xff]  ;;  %v3631_v51 = vld [vmem:[%s4525_s5 + $0x30] sm:$0xff] }
 0x1fc   : > { %2187 = vmatpush.bf16.msra.mxu0 %v2909_v27  ;;  %2200 = vmatpush.bf16.msra.mxu1 %v3037_v55  ;;  %v3636_v27 = vld [vmem:[%s4525_s5 + $0x58] sm:$0xff] }
 0x1fd   : > { %2213 = vmatpush.bf16.msra.mxu2 %v3165_v36  ;;  %2226 = vmatpush.bf16.msra.mxu3 %v3293_v54  ;;  %v3648_v55 = vld [vmem:[%s4525_s5 + $0xb8] sm:$0xff]  ;;  %v3634_v36 = vld [vmem:[%s4525_s5 + $0x48] sm:$0xff] }
 0x1fe   : > { %v3646_v54 = vld [vmem:[%s4525_s5 + $0xa8] sm:$0xff] }
 0x200   : > { %2188 = vmatpush.bf16.msra.mxu0 %v2893_v40  ;;  %2201 = vmatpush.bf16.msra.mxu1 %v3021_v43  ;;  %v3644_v43 = vld [vmem:[%s4525_s5 + $0x98] sm:$0xff] }
 0x201   : > { %2214 = vmatpush.bf16.msra.mxu2 %v3149_v63  ;;  %2227 = vmatpush.bf16.msra.mxu3 %v3277_v46 }
 0x204   : > { %2189 = vmatpush.bf16.msra.mxu0 %v2877_v26  ;;  %2202 = vmatpush.bf16.msra.mxu1 %v3005_v57  ;;  %v2021_v57 = vperm.slane %v4432_v58, 1 }
 0x205   : > { %2215 = vmatpush.bf16.msra.mxu2 %v3133_v48  ;;  %2228 = vmatpush.bf16.msra.mxu3 %v3261_v52 }
 0x208   : > { %2190 = vmatpush.bf16.msra.mxu0 %v2861_v8  ;;  %2203 = vmatpush.bf16.msra.mxu1 %v2989_v3 }
 0x209   : > { %2216 = vmatpush.bf16.msra.mxu2 %v3117_v15  ;;  %2229 = vmatpush.bf16.msra.mxu3 %v3245_v30  ;;  %v3653_v30 = vld [vmem:[%s4525_s5 + $0xe0] sm:$0xff] }
 0x20c   : > { %2191 = vmatpush.bf16.msra.mxu0 %v2845_v22  ;;  %2204 = vmatpush.bf16.msra.mxu1 %v2973_v23  ;;  %v2022_v22 = vperm.slane %v4432_v58, 2 }
 0x20d   : > { %2217 = vmatpush.bf16.msra.mxu2 %v3101_v31  ;;  %2230 = vmatpush.bf16.msra.mxu3 %v3229_v2  ;;  %v3651_v2 = vld [vmem:[%s4525_s5 + $0xd0] sm:$0xff] }
 0x20f   : > { %2192 = vmatmul.bf16.vlgmr.msra.gmra.mxu0 %v4351_v47  ;;  %2205 = vmatmul.bf16.vlgmr.msra.gmra.mxu1 %v4353_v14  ;;  %v3628_v47 = vld [vmem:[%s4525_s5 + $0x18] sm:$0xff] }
 0x210   : > { %2501 = vmatpush.bf16.msrb.mxu0 %v3632_v53  ;;  %2218 = vmatmul.bf16.vlgmr.msra.gmra.mxu2 %v4355_v24  ;;  %v3640_v14 = vld [vmem:[%s4525_s5 + $0x78] sm:$0xff]  ;;  %v3627_v24 = vld [vmem:[%s4525_s5 + $0x10] sm:$0xff] }
 0x211   : > { %2231 = vmatmul.bf16.vlgmr.msra.gmra.mxu3 %v4357_v25  ;;  %2514 = vmatpush.bf16.msrb.mxu1 %v3640_v14  ;;  %v3639_v25 = vld [vmem:[%s4525_s5 + $0x70] sm:$0xff] }
 0x212   : > { %2527 = vmatpush.bf16.msrb.mxu2 %v3648_v55  ;;  %2540 = vmatpush.bf16.msrb.mxu3 %v3656_v0 }
 0x214   : > { %2502 = vmatpush.bf16.msrb.mxu0 %v3631_v51  ;;  %v3650_v51 = vld [vmem:[%s4525_s5 + $0xc8] sm:$0xff] }
 0x215   : > { %2515 = vmatpush.bf16.msrb.mxu1 %v3639_v25 }
 0x216   : > { %2528 = vmatpush.bf16.msrb.mxu2 %v3647_v10  ;;  %2541 = vmatpush.bf16.msrb.mxu3 %v3655_v34 }
 0x218   : > { %2503 = vmatpush.bf16.msrb.mxu0 %v3630_v32 }
 0x219   : > { %2516 = vmatpush.bf16.msrb.mxu1 %v3638_v35 }
 0x21a   : > { %2529 = vmatpush.bf16.msrb.mxu2 %v3646_v54  ;;  %2542 = vmatpush.bf16.msrb.mxu3 %v3654_v29 }
 0x21c   : > { %2504 = vmatpush.bf16.msrb.mxu0 %v3629_v33 }
 0x21d   : > { %2517 = vmatpush.bf16.msrb.mxu1 %v3637_v17 }
 0x21e   : > { %2530 = vmatpush.bf16.msrb.mxu2 %v3645_v61  ;;  %2543 = vmatpush.bf16.msrb.mxu3 %v3653_v30 }
 0x220   : > { %2505 = vmatpush.bf16.msrb.mxu0 %v3628_v47 }
 0x221   : > { %2518 = vmatpush.bf16.msrb.mxu1 %v3636_v27 }
 0x222   : > { %2531 = vmatpush.bf16.msrb.mxu2 %v3644_v43  ;;  %2544 = vmatpush.bf16.msrb.mxu3 %v3652_v19 }
 0x224   : > { %2506 = vmatpush.bf16.msrb.mxu0 %v3627_v24 }
 0x225   : > { %2519 = vmatpush.bf16.msrb.mxu1 %v3635_v41  ;;  %v2023_v41 = vperm.slane %v4432_v58, 3 }
 0x226   : > { %2532 = vmatpush.bf16.msrb.mxu2 %v3643_v21  ;;  %2545 = vmatpush.bf16.msrb.mxu3 %v3651_v2 }
 0x228   : > { %2507 = vmatpush.bf16.msrb.mxu0 %v3626_v37  ;;  %v3649_v37 = vld [vmem:[%s4525_s5 + $0xc0] sm:$0xff] }
 0x229   : > { %2520 = vmatpush.bf16.msrb.mxu1 %v3634_v36 }
 0x22a   : > { %2533 = vmatpush.bf16.msrb.mxu2 %v3642_v5  ;;  %2546 = vmatpush.bf16.msrb.mxu3 %v3650_v51 }
 0x22c   : > { %2508 = vmatpush.bf16.msrb.mxu0 %v3625_v38 }
 0x22d   : > { %2521 = vmatpush.bf16.msrb.mxu1 %v3633_v11 }
 0x22e   : > { %2534 = vmatpush.bf16.msrb.mxu2 %v3641_v20  ;;  %2547 = vmatpush.bf16.msrb.mxu3 %v3649_v37 }
 0x24b   : > { %v2037_v28 = vpop.f32.mrf.mxu0  ;;  %v2050_v42 = vpop.f32.mrf.mxu1 }
 0x24c   : > { %v2038_v40 = vadd.f32 %v2037_v28, %v2020_v59 }
 0x24e   : > { %v2051_v62 = vadd.f32 %v2050_v42, %v2038_v40 }
 0x252   : > { %v2063_v63 = vpop.f32.mrf.mxu2  ;;  %v2076_v46 = vpop.f32.mrf.mxu3 }
 0x253   : > { %v2064_v49 = vadd.f32 %v2063_v63, %v2051_v62  ;;  %v2039_v44 = vpop.f32.mrf.mxu0  ;;  %v2052_v56 = vpop.f32.mrf.mxu1 }
 0x255   : > { %v2077_v4 = vadd.f32 %v2076_v46, %v2064_v49 }
 0x257   : > { %v2236_v7 = vmax.f32 %v2077_v4, 0.0 }
 0x259   : > { %v2240_v26 = vpack.c.bf16 %v2236_v7, %v2236_v7  ;;  %v2308_v7 = vld [vmem:[%s4526_s6] sm:$0x1] }
 0x25a   : > { %v2065_v48 = vpop.f32.mrf.mxu2  ;;  %v2078_v52 = vpop.f32.mrf.mxu3 }
 0x25b   : > { %2509 = vmatmul.bf16.vlgmr.msrb.gmra.mxu0 %v2240_v26  ;;  %v2089_v12 = vpop.f32.mrf.mxu0  ;;  %v2102_v60 = vpop.f32.mrf.mxu1 }
 0x25c   : > { %v2090_v13 = vadd.f32 %v2089_v12, %v2021_v57 }
 0x25e   : > { %v2103_v1 = vadd.f32 %v2102_v60, %v2090_v13 }
 0x262   : > { %v2115_v8 = vpop.f32.mrf.mxu2  ;;  %v2128_v3 = vpop.f32.mrf.mxu3 }
 0x263   : > { %v2116_v6 = vadd.f32 %v2115_v8, %v2103_v1  ;;  %v2091_v16 = vpop.f32.mrf.mxu0  ;;  %v2104_v15 = vpop.f32.mrf.mxu1 }
 0x265   : > { %v2129_v50 = vadd.f32 %v2128_v3, %v2116_v6 }
 0x267   : > { %v2237_v18 = vmax.f32 %v2129_v50, 0.0 }
 0x269   : > { %v2241_v45 = vpack.c.bf16 %v2237_v18, %v2237_v18 }
 0x26a   : > { %v2117_v39 = vpop.f32.mrf.mxu2  ;;  %v2130_v9 = vpop.f32.mrf.mxu3 }
 0x26b   : > { %2522 = vmatmul.bf16.vlgmr.msrb.gmra.mxu1 %v2241_v45 }
 0x26c   : > { %v2141_v23 = vpop.f32.mrf.mxu0  ;;  %v2154_v31 = vpop.f32.mrf.mxu1 }
 0x26d   : > { %v2142_v53 = vadd.f32 %v2141_v23, %v2022_v22 }
 0x26f   : > { %v2155_v32 = vadd.f32 %v2154_v31, %v2142_v53 }
 0x274   : > { %v2143_v24 = vpop.f32.mrf.mxu0  ;;  %v2156_v25 = vpop.f32.mrf.mxu1 }
 0x275   : > { %v2167_v33 = vpop.f32.mrf.mxu2  ;;  %v2180_v47 = vpop.f32.mrf.mxu3 }
 0x276   : > { %v2168_v14 = vadd.f32 %v2167_v33, %v2155_v32 }
 0x278   : > { %v2181_v35 = vadd.f32 %v2180_v47, %v2168_v14 }
 0x27a   : > { %v2238_v38 = vmax.f32 %v2181_v35, 0.0 }
 0x27c   : > { %v2242_v17 = vpack.c.bf16 %v2238_v38, %v2238_v38 }
 0x27d   : > { %v2169_v27 = vpop.f32.mrf.mxu2  ;;  %v2182_v55 = vpop.f32.mrf.mxu3 }
 0x27e   : > { %2535 = vmatmul.bf16.vlgmr.msrb.gmra.mxu2 %v2242_v17 }
 0x28c   : > { %v2193_v10 = vpop.f32.mrf.mxu0  ;;  %v2206_v36 = vpop.f32.mrf.mxu1 }
 0x28d   : > { %v2194_v54 = vadd.f32 %v2193_v10, %v2023_v41 }
 0x28f   : > { %v2207_v59 = vadd.f32 %v2206_v36, %v2194_v54 }
 0x293   : > { %v2219_v11 = vpop.f32.mrf.mxu2 }
 0x294   : > { %v2232_v61 = vpop.f32.mrf.mxu3  ;;  %v2220_v28 = vadd.f32 %v2219_v11, %v2207_v59  ;;  %v2195_v42 = vpop.f32.mrf.mxu0 }
 0x295   : > { %v2208_v40 = vpop.f32.mrf.mxu1 }
 0x296   : > { %v2233_v43 = vadd.f32 %v2232_v61, %v2220_v28 }
 0x298   : > { %v2239_v21 = vmax.f32 %v2233_v43, 0.0 }
 0x29a   : > { %v2243_v62 = vpack.c.bf16 %v2239_v21, %v2239_v21 }
 0x29b   : > { %v2221_v63 = vpop.f32.mrf.mxu2 }
 0x29c   : > { %v2234_v46 = vpop.f32.mrf.mxu3  ;;  %2548 = vmatmul.bf16.vlgmr.msrb.gmra.mxu3 %v2243_v62 }
 0x2d8   : > { %v2510_v49 = vpop.f32.mrf.mxu0 }
 0x2d9   : > { %v2511_v26 = vadd.f32 %v2510_v49, %v2308_v7 }
 0x2e0   : > { %v2512_v44 = vpop.f32.mrf.mxu0 }
 0x2e8   : > { %v2523_v58 = vpop.f32.mrf.mxu1 }
 0x2e9   : > { %v2524_v57 = vadd.f32 %v2523_v58, %v2511_v26 }
 0x2f0   : > { %v2525_v56 = vpop.f32.mrf.mxu1 }
 0x301   : > { %v2536_v4 = vpop.f32.mrf.mxu2 }
 0x302   : > { %v2537_v20 = vadd.f32 %v2536_v4, %v2524_v57 }
 0x309   : > { %v2538_v5 = vpop.f32.mrf.mxu2 }
 0x31f   : > { %v2549_v0 = vpop.f32.mrf.mxu3 }
 0x320   : > { %v2550_v48 = vadd.f32 %v2549_v0, %v2537_v20 }
 0x322   : > { %v2553_v52 = vmax.f32 %v2550_v48, 0.0 }
 0x324   : > { %2554 = vst [vmem:[%s327_s15] sm:$0x1] %v2553_v52 }
 0x325   : > { %3824 = shalt.err (!%p3821_p9)
}
 0x326   : > { %3665 = dma.vmem_to_hbm [thread:$0]  (%p3971_p4), %s2567_s16, 16, %s2569_s19, %s2556_s20  }
 0x327   : > { %v2551_v12 = vpop.f32.mrf.mxu3 }
 0x328 PF: > { %p3682_p10 = scmp.ge.s32.totalorder %s3883_s29, 2  ;;  %s2580_s10 = sand.u32 1, %s3863_s24  }
 0x329   : > { %s2581_s17 = scalar_lea.sflag [#allocation5], %s2580_s10 }
 0x32a   : > { %p3675_p11 = pnand %p3682_p10, %p3978_p8 }
 0x32c   : > { %p3676_p12 = pneg %p3675_p11 }
 0x32e   : > { %3858 = dma.done.wait (%p3676_p12), %s2581_s17, 16  }
 0x32f   : > { %3860 = vsyncadd (%p3676_p12), %s2581_s17, 4294967280  ;;  %s22_s29 = sadd.s32 1, %s3883_s29   ;;  %s4534_s24 = smov %s3867_s25 }
 0x330   : > { %p19_p13 = scmp.ge.s32.totalorder %s22_s29, 4   ;;  %s4535_s25 = smov %s3871_s26 }
 0x331   : > { %s4536_s26 = smov %s3984_s14  ;;  %s4537_s27 = smov %s3879_s28 }
 0x332   : > { %s4538_s28 = smov %s4540_s9  ;;  %21 = sbr.rel (!%p19_p13) target bundleno = 6 (0x6), region = 100 }
 0x337   :  { %2586 = vsyncpa [#allocation4], 1 }
 0x338   :  { %2588 = vsyncpa [#allocation4 + $0x1], 1 }
 0x339   :  { %2589 = vsyncpa [#allocation7], 1 }
 0x33a   :  { %2590 = vsyncpa [#allocation5], 1 }
 0x33b   :  { %2592 = vsyncpa [#allocation5 + $0x1], 1 }

</bundles_post_ra>
